<compile_context>
chip_gen: v5e
topology: v5e:2x2
jax: 0.10.0
libtpu: 0.0.40
codegen_flags: <defaults>
</compile_context>

<pallas_src>
import functools
import math

import jax
import jax.numpy as jnp
from jax.experimental import pallas as pl
from jax.experimental.pallas import tpu as pltpu


# ----------------------------- in-kernel helpers -----------------------------

def _layernorm(x, gamma, beta, eps=1e-5):
    # torch.nn.LayerNorm: biased variance, eps inside the sqrt, affine params.
    mean = jnp.mean(x, axis=-1, keepdims=True)
    var = jnp.mean(jnp.square(x - mean), axis=-1, keepdims=True)
    return (x - mean) * jax.lax.rsqrt(var + eps) * gamma + beta


# --------------------------------- kernel ------------------------------------

def skip_attention_kernel(x_ref, skip_ref,
                          gq_ref, bq_ref, gkv_ref, bkv_ref,
                          wq_ref, wk_ref, wv_ref, wo_ref, bo_ref,
                          o_ref,
                          q_scr, m_scr, l_scr, acc_scr,
                          *, num_heads):
    ki = pl.program_id(2)
    nk = pl.num_programs(2)
    _, tq, D = x_ref.shape
    H = num_heads

    # ---- once per query tile: project Q (cached in VMEM), reset softmax state.
    #      (softmax scale is pre-folded into w_q on the host)
    @pl.when(ki == 0)
    def _init():
        xq = x_ref[0].astype(jnp.float32)
        xn = _layernorm(xq, gq_ref[...], bq_ref[...]).astype(jnp.bfloat16)
        for h in range(H):                      # per-head weight slab: no slicing
            q_scr[h] = jnp.dot(xn, wq_ref[h],
                               preferred_element_type=jnp.float32
                               ).astype(jnp.bfloat16)
        m_scr[...] = jnp.full(m_scr.shape, -jnp.inf, dtype=jnp.float32)
        l_scr[...] = jnp.zeros(l_scr.shape, dtype=jnp.float32)
        acc_scr[...] = jnp.zeros(acc_scr.shape, dtype=jnp.float32)

    # ---- every (q_tile, kv_tile) step: project K/V for this tile, online softmax.
    sn = _layernorm(skip_ref[0].astype(jnp.float32),
                    gkv_ref[...], bkv_ref[...]).astype(jnp.bfloat16)
    for h in range(H):                          # static loop; all dots are 2-D MXU ops
        k_h = jnp.dot(sn, wk_ref[h],
                      preferred_element_type=jnp.float32).astype(jnp.bfloat16)
        v_h = jnp.dot(sn, wv_ref[h],
                      preferred_element_type=jnp.float32).astype(jnp.bfloat16)
        # scores = q_h @ k_h^T  (contract last dims, no materialized transpose)
        s = jax.lax.dot_general(q_scr[h], k_h, (((1,), (1,)), ((), ())),
                                preferred_element_type=jnp.float32)
        m_prev = m_scr[h]
        m_new = jnp.maximum(m_prev, jnp.max(s, axis=-1, keepdims=True))
        alpha = jnp.exp(m_prev - m_new)
        p = jnp.exp(s - m_new)
        l_scr[h] = alpha * l_scr[h] + jnp.sum(p, axis=-1, keepdims=True)
        acc_scr[h] = alpha * acc_scr[h] + jnp.dot(
            p.astype(jnp.bfloat16), v_h, preferred_element_type=jnp.float32)
        m_scr[h] = m_new

    # ---- last kv tile: normalize, per-head output projection (MXU accumulate),
    #      add bias + residual, write the query tile.
    @pl.when(ki == nk - 1)
    def _finalize():
        out = x_ref[0].astype(jnp.float32) + bo_ref[...]    # residual + to_o bias
        for h in range(H):
            o_h = acc_scr[h] * pl.reciprocal(l_scr[h], approx=True)   # EUP reciprocal
            out = out + jnp.dot(o_h.astype(jnp.bfloat16), wo_ref[h],
                                preferred_element_type=jnp.float32)
        o_ref[0] = out.astype(o_ref.dtype)


# -------------------------------- wrapper -------------------------------------

def _pick_block(n, preferred=(256, 128)):
    for t in preferred:
        if n % t == 0:
            return t
    return n           # full extent (always a legal block shape)


def skip_attention(x, skip, params, num_heads, *, block_q=None, block_k=None):
    B, L, D = x.shape
    assert skip.shape == (B, L, D), "skip must have the same shape as x"
    H = num_heads
    assert D % H == 0
    hd = D // H

    block_q = _pick_block(L) if block_q is None else block_q
    block_k = _pick_block(L) if block_k is None else block_k
    assert L % block_q == 0 and L % block_k == 0
    nq, nk = L // block_q, L // block_k

    # Host-side weight prep: (in, out) layout split into per-head slabs, bf16 for MXU.
    # Softmax scale 1/sqrt(hd) is folded into w_q (free at runtime).
    sm_scale = 1.0 / math.sqrt(hd)
    w_kv = params['w_kv']
    w_k, w_v = w_kv[:, :D], w_kv[:, D:]
    wq_h = jnp.transpose((params['w_q'] * sm_scale).reshape(D, H, hd),
                         (1, 0, 2)).astype(jnp.bfloat16)
    wk_h = jnp.transpose(w_k.reshape(D, H, hd), (1, 0, 2)).astype(jnp.bfloat16)
    wv_h = jnp.transpose(w_v.reshape(D, H, hd), (1, 0, 2)).astype(jnp.bfloat16)
    wo_h = params['w_o'].reshape(H, hd, D).astype(jnp.bfloat16)

    gq = params['g_q'].reshape(1, D).astype(jnp.float32)
    bq = params['b_q'].reshape(1, D).astype(jnp.float32)
    gkv = params['g_kv'].reshape(1, D).astype(jnp.float32)
    bkv = params['b_kv'].reshape(1, D).astype(jnp.float32)
    bo = params['b_o'].reshape(1, D).astype(jnp.float32)

    kernel = functools.partial(skip_attention_kernel, num_heads=H)

    flops = int(B * (8 * L * D * D + 4 * L * L * D))
    transcendentals = int(B * H * L * L)
    bytes_accessed = int(4 * 3 * B * L * D          # x, skip read; out written
                         + 2 * 4 * D * D            # bf16 projection weights
                         + 4 * 5 * D)               # LN params + output bias

    def vec_spec():
        return pl.BlockSpec((1, D), lambda b, qi, ki: (0, 0))

    grid_spec = pltpu.PrefetchScalarGridSpec(
        num_scalar_prefetch=0,
        grid=(B, nq, nk),
        in_specs=[
            pl.BlockSpec((1, block_q, D), lambda b, qi, ki: (b, qi, 0)),   # x (query tile)
            pl.BlockSpec((1, block_k, D), lambda b, qi, ki: (b, ki, 0)),   # skip (kv tile)
            vec_spec(), vec_spec(), vec_spec(), vec_spec(),                # LN gamma/beta
            pl.BlockSpec((H, D, hd), lambda b, qi, ki: (0, 0, 0)),         # w_q heads
            pl.BlockSpec((H, D, hd), lambda b, qi, ki: (0, 0, 0)),         # w_k heads
            pl.BlockSpec((H, D, hd), lambda b, qi, ki: (0, 0, 0)),         # w_v heads
            pl.BlockSpec((H, hd, D), lambda b, qi, ki: (0, 0, 0)),         # w_o heads
            vec_spec(),                                                    # b_o
        ],
        out_specs=pl.BlockSpec((1, block_q, D), lambda b, qi, ki: (b, qi, 0)),
        scratch_shapes=[
            pltpu.VMEM((H, block_q, hd), jnp.bfloat16),   # cached projected Q
            pltpu.VMEM((H, block_q, 1), jnp.float32),     # running row max
            pltpu.VMEM((H, block_q, 1), jnp.float32),     # running softmax denom
            pltpu.VMEM((H, block_q, hd), jnp.float32),    # output accumulator
        ],
    )

    return pl.pallas_call(
        kernel,
        out_shape=jax.ShapeDtypeStruct((B, L, D), x.dtype),
        grid_spec=grid_spec,
        compiler_params=pltpu.CompilerParams(
            dimension_semantics=("parallel", "parallel", "arbitrary"),
            vmem_limit_bytes=48 * 1024 * 1024,
        ),
        cost_estimate=pl.CostEstimate(flops=flops,
                                      transcendentals=transcendentals,
                                      bytes_accessed=bytes_accessed),
    )(x, skip, gq, bq, gkv, bkv, wq_h, wk_h, wv_h, wo_h, bo)


# -------------------------- pure-JAX (f32) reference ---------------------------

def skip_attention_ref(x, skip, params, num_heads):
    B, L, D = x.shape
    H = num_heads
    hd = D // H

    def ln(t, g, b, eps=1e-5):
        mu = jnp.mean(t, axis=-1, keepdims=True)
        var = jnp.mean(jnp.square(t - mu), axis=-1, keepdims=True)
        return (t - mu) * jax.lax.rsqrt(var + eps) * g + b

    q = ln(x, params['g_q'], params['b_q']) @ params['w_q']
    kv = ln(skip, params['g_kv'], params['b_kv']) @ params['w_kv']
    k, v = kv[..., :D], kv[..., D:]

    def split_heads(t):
        return t.reshape(B, L, H, hd).transpose(0, 2, 1, 3)

    q, k, v = map(split_heads, (q, k, v))
    s = jnp.einsum('bhqe,bhke->bhqk', q, k) / math.sqrt(hd)
    p = jax.nn.softmax(s, axis=-1)
    o = jnp.einsum('bhqk,bhke->bhqe', p, v)
    o = o.transpose(0, 2, 1, 3).reshape(B, L, D)
    return x + o @ params['w_o'] + params['b_o']


# ---------------------------------- main ---------------------------------------

if __name__ == "__main__":
    B, L, D = 2, 8, 32          # batch, seq, dim
    H = 4                       # heads

    key = jax.random.PRNGKey(0)
    ks = jax.random.split(key, 10)

    params = {
        'g_q':  1.0 + 0.2 * jax.random.normal(ks[0], (D,), jnp.float32),
        'b_q':  0.2 * jax.random.normal(ks[1], (D,), jnp.float32),
        'g_kv': 1.0 + 0.2 * jax.random.normal(ks[2], (D,), jnp.float32),
        'b_kv': 0.2 * jax.random.normal(ks[3], (D,), jnp.float32),
        'w_q':  0.1 * jax.random.normal(ks[4], (D, D), jnp.float32),
        'w_kv': 0.1 * jax.random.normal(ks[5], (D, 2 * D), jnp.float32),
        'w_o':  0.1 * jax.random.normal(ks[6], (D, D), jnp.float32),
        'b_o':  0.1 * jax.random.normal(ks[7], (D,), jnp.float32),
    }

    x = jax.random.normal(ks[8], (B, L, D), jnp.float32)
    skip = jax.random.normal(ks[9], (B, L, D), jnp.float32)

    out = jax.block_until_ready(skip_attention(x, skip, params, num_heads=H))
    ref = jax.block_until_ready(skip_attention_ref(x, skip, params, num_heads=H))

    max_diff = float(jnp.max(jnp.abs(out - ref)))
    assert out.shape == (B, L, D)
    # bf16 MXU operands + approx reciprocal vs. the pure-f32 reference -> allow ~1e-2.
    assert max_diff < 5e-2, f"mismatch vs reference: {max_diff}"

    print("KERNEL_OK")
</pallas_src>

<mosaic_0001>
module attributes {stable_mosaic.version = 11 : i64} {
  func.func @skip_attention_kernel(%arg0: i32, %arg1: i32, %arg2: i32, %arg3: memref<1x8x32xf32, #tpu.memory_space<vmem>>, %arg4: memref<1x8x32xf32, #tpu.memory_space<vmem>>, %arg5: memref<1x32xf32, #tpu.memory_space<vmem>>, %arg6: memref<1x32xf32, #tpu.memory_space<vmem>>, %arg7: memref<1x32xf32, #tpu.memory_space<vmem>>, %arg8: memref<1x32xf32, #tpu.memory_space<vmem>>, %arg9: memref<4x32x8xbf16, #tpu.memory_space<vmem>>, %arg10: memref<4x32x8xbf16, #tpu.memory_space<vmem>>, %arg11: memref<4x32x8xbf16, #tpu.memory_space<vmem>>, %arg12: memref<4x8x32xbf16, #tpu.memory_space<vmem>>, %arg13: memref<1x32xf32, #tpu.memory_space<vmem>>, %arg14: memref<1x8x32xf32, #tpu.memory_space<vmem>>, %arg15: memref<4x8x8xbf16, #tpu.memory_space<vmem>>, %arg16: memref<4x8x1xf32, #tpu.memory_space<vmem>>, %arg17: memref<4x8x1xf32, #tpu.memory_space<vmem>>, %arg18: memref<4x8x8xf32, #tpu.memory_space<vmem>>) attributes {dimension_semantics = [#tpu.dimension_semantics<parallel>, #tpu.dimension_semantics<parallel>, #tpu.dimension_semantics<arbitrary>], iteration_bounds = array<i64: 2, 1, 1>, scalar_prefetch = 0 : i64, scratch_operands = 4 : i64, tpu.core_type = #tpu.core_type<tc>, window_params = [{transform_indices = @transform_0, window_bounds = array<i64: 1, 8, 32>}, {transform_indices = @transform_1, window_bounds = array<i64: 1, 8, 32>}, {pipeline_mode = #tpu.pipeline_mode<synchronous>, transform_indices = @transform_2, window_bounds = array<i64: 1, 32>}, {pipeline_mode = #tpu.pipeline_mode<synchronous>, transform_indices = @transform_3, window_bounds = array<i64: 1, 32>}, {pipeline_mode = #tpu.pipeline_mode<synchronous>, transform_indices = @transform_4, window_bounds = array<i64: 1, 32>}, {pipeline_mode = #tpu.pipeline_mode<synchronous>, transform_indices = @transform_5, window_bounds = array<i64: 1, 32>}, {pipeline_mode = #tpu.pipeline_mode<synchronous>, transform_indices = @transform_6, window_bounds = array<i64: 4, 32, 8>}, {pipeline_mode = #tpu.pipeline_mode<synchronous>, transform_indices = @transform_7, window_bounds = array<i64: 4, 32, 8>}, {pipeline_mode = #tpu.pipeline_mode<synchronous>, transform_indices = @transform_8, window_bounds = array<i64: 4, 32, 8>}, {pipeline_mode = #tpu.pipeline_mode<synchronous>, transform_indices = @transform_9, window_bounds = array<i64: 4, 8, 32>}, {pipeline_mode = #tpu.pipeline_mode<synchronous>, transform_indices = @transform_10, window_bounds = array<i64: 1, 32>}, {transform_indices = @transform_11, window_bounds = array<i64: 1, 8, 32>}]} {
    %c0_i32 = arith.constant 0 : i32
    %0 = arith.cmpi eq, %arg2, %c0_i32 : i32
    %1 = arith.extui %0 : i1 to i32
    %c0_i32_0 = arith.constant 0 : i32
    %2 = arith.cmpi ne, %1, %c0_i32_0 : i32
    scf.if %2 {
      %c0_142 = arith.constant 0 : index
      %c0_143 = arith.constant 0 : index
      %c0_144 = arith.constant 0 : index
      %205 = vector.load %arg3[%c0_142, %c0_143, %c0_144] : memref<1x8x32xf32, #tpu.memory_space<vmem>>, vector<1x8x32xf32>
      %206 = vector.shape_cast %205 : vector<1x8x32xf32> to vector<8x32xf32>
      %c0_145 = arith.constant 0 : index
      %c0_146 = arith.constant 0 : index
      %207 = vector.load %arg5[%c0_145, %c0_146] : memref<1x32xf32, #tpu.memory_space<vmem>>, vector<1x32xf32>
      %c0_147 = arith.constant 0 : index
      %c0_148 = arith.constant 0 : index
      %208 = vector.load %arg6[%c0_147, %c0_148] : memref<1x32xf32, #tpu.memory_space<vmem>>, vector<1x32xf32>
      %cst_149 = arith.constant dense<0.000000e+00> : vector<8xf32>
      %209 = vector.multi_reduction <add>, %206, %cst_149 [1] : vector<8x32xf32> to vector<8xf32>
      %210 = vector.shape_cast %209 : vector<8xf32> to vector<8x1xf32>
      %cst_150 = arith.constant 3.200000e+01 : f32
      %211 = vector.broadcast %cst_150 : f32 to vector<8x1xf32>
      %212 = arith.divf %210, %211 : vector<8x1xf32>
      %213 = vector.broadcast %212 : vector<8x1xf32> to vector<8x32xf32>
      %214 = arith.subf %206, %213 : vector<8x32xf32>
      %215 = arith.mulf %214, %214 : vector<8x32xf32>
      %cst_151 = arith.constant dense<0.000000e+00> : vector<8xf32>
      %216 = vector.multi_reduction <add>, %215, %cst_151 [1] : vector<8x32xf32> to vector<8xf32>
      %217 = vector.shape_cast %216 : vector<8xf32> to vector<8x1xf32>
      %cst_152 = arith.constant 3.200000e+01 : f32
      %218 = vector.broadcast %cst_152 : f32 to vector<8x1xf32>
      %219 = arith.divf %217, %218 : vector<8x1xf32>
      %220 = vector.broadcast %212 : vector<8x1xf32> to vector<8x32xf32>
      %221 = arith.subf %206, %220 : vector<8x32xf32>
      %cst_153 = arith.constant 9.99999974E-6 : f32
      %222 = vector.broadcast %cst_153 : f32 to vector<8x1xf32>
      %223 = arith.addf %219, %222 : vector<8x1xf32>
      %224 = math.rsqrt %223 : vector<8x1xf32>
      %225 = vector.broadcast %224 : vector<8x1xf32> to vector<8x32xf32>
      %226 = arith.mulf %221, %225 : vector<8x32xf32>
      %227 = vector.broadcast %207 : vector<1x32xf32> to vector<8x32xf32>
      %228 = arith.mulf %226, %227 : vector<8x32xf32>
      %229 = vector.broadcast %208 : vector<1x32xf32> to vector<8x32xf32>
      %230 = arith.addf %228, %229 : vector<8x32xf32>
      %231 = arith.truncf %230 : vector<8x32xf32> to vector<8x32xbf16>
      %c0_154 = arith.constant 0 : index
      %c0_155 = arith.constant 0 : index
      %c0_156 = arith.constant 0 : index
      %232 = vector.load %arg9[%c0_154, %c0_155, %c0_156] : memref<4x32x8xbf16, #tpu.memory_space<vmem>>, vector<1x32x8xbf16>
      %233 = vector.shape_cast %232 : vector<1x32x8xbf16> to vector<32x8xbf16>
      %cst_157 = arith.constant dense<0.000000e+00> : vector<8x8xf32>
      %234 = tpu.matmul %231, %233, %cst_157 {dimension_numbers = #tpu.dot_dimension_numbers<[1], [0], [0], [1], [0, 0, 1, 1], [], []>} : vector<8x32xbf16>, vector<32x8xbf16>, vector<8x8xf32> -> vector<8x8xf32>
      %235 = arith.truncf %234 : vector<8x8xf32> to vector<8x8xbf16>
      %c0_158 = arith.constant 0 : index
      %c0_159 = arith.constant 0 : index
      %c0_160 = arith.constant 0 : index
      %236 = vector.load %arg15[%c0_158, %c0_159, %c0_160] : memref<4x8x8xbf16, #tpu.memory_space<vmem>>, vector<1x8x8xbf16>
      %237 = vector.shape_cast %236 : vector<1x8x8xbf16> to vector<8x8xbf16>
      %238 = vector.shape_cast %235 : vector<8x8xbf16> to vector<1x8x8xbf16>
      tpu.vector_store %arg15[%c0_158, %c0_159, %c0_160], %238 {strides = array<i32>} : memref<4x8x8xbf16, #tpu.memory_space<vmem>>, vector<1x8x8xbf16>,
      %c1_161 = arith.constant 1 : index
      %c0_162 = arith.constant 0 : index
      %c0_163 = arith.constant 0 : index
      %239 = vector.load %arg9[%c1_161, %c0_162, %c0_163] : memref<4x32x8xbf16, #tpu.memory_space<vmem>>, vector<1x32x8xbf16>
      %240 = vector.shape_cast %239 : vector<1x32x8xbf16> to vector<32x8xbf16>
      %cst_164 = arith.constant dense<0.000000e+00> : vector<8x8xf32>
      %241 = tpu.matmul %231, %240, %cst_164 {dimension_numbers = #tpu.dot_dimension_numbers<[1], [0], [0], [1], [0, 0, 1, 1], [], []>} : vector<8x32xbf16>, vector<32x8xbf16>, vector<8x8xf32> -> vector<8x8xf32>
      %242 = arith.truncf %241 : vector<8x8xf32> to vector<8x8xbf16>
      %c1_165 = arith.constant 1 : index
      %c0_166 = arith.constant 0 : index
      %c0_167 = arith.constant 0 : index
      %243 = vector.load %arg15[%c1_165, %c0_166, %c0_167] : memref<4x8x8xbf16, #tpu.memory_space<vmem>>, vector<1x8x8xbf16>
      %244 = vector.shape_cast %243 : vector<1x8x8xbf16> to vector<8x8xbf16>
      %245 = vector.shape_cast %242 : vector<8x8xbf16> to vector<1x8x8xbf16>
      tpu.vector_store %arg15[%c1_165, %c0_166, %c0_167], %245 {strides = array<i32>} : memref<4x8x8xbf16, #tpu.memory_space<vmem>>, vector<1x8x8xbf16>,
      %c2_168 = arith.constant 2 : index
      %c0_169 = arith.constant 0 : index
      %c0_170 = arith.constant 0 : index
      %246 = vector.load %arg9[%c2_168, %c0_169, %c0_170] : memref<4x32x8xbf16, #tpu.memory_space<vmem>>, vector<1x32x8xbf16>
      %247 = vector.shape_cast %246 : vector<1x32x8xbf16> to vector<32x8xbf16>
      %cst_171 = arith.constant dense<0.000000e+00> : vector<8x8xf32>
      %248 = tpu.matmul %231, %247, %cst_171 {dimension_numbers = #tpu.dot_dimension_numbers<[1], [0], [0], [1], [0, 0, 1, 1], [], []>} : vector<8x32xbf16>, vector<32x8xbf16>, vector<8x8xf32> -> vector<8x8xf32>
      %249 = arith.truncf %248 : vector<8x8xf32> to vector<8x8xbf16>
      %c2_172 = arith.constant 2 : index
      %c0_173 = arith.constant 0 : index
      %c0_174 = arith.constant 0 : index
      %250 = vector.load %arg15[%c2_172, %c0_173, %c0_174] : memref<4x8x8xbf16, #tpu.memory_space<vmem>>, vector<1x8x8xbf16>
      %251 = vector.shape_cast %250 : vector<1x8x8xbf16> to vector<8x8xbf16>
      %252 = vector.shape_cast %249 : vector<8x8xbf16> to vector<1x8x8xbf16>
      tpu.vector_store %arg15[%c2_172, %c0_173, %c0_174], %252 {strides = array<i32>} : memref<4x8x8xbf16, #tpu.memory_space<vmem>>, vector<1x8x8xbf16>,
      %c3_175 = arith.constant 3 : index
      %c0_176 = arith.constant 0 : index
      %c0_177 = arith.constant 0 : index
      %253 = vector.load %arg9[%c3_175, %c0_176, %c0_177] : memref<4x32x8xbf16, #tpu.memory_space<vmem>>, vector<1x32x8xbf16>
      %254 = vector.shape_cast %253 : vector<1x32x8xbf16> to vector<32x8xbf16>
      %cst_178 = arith.constant dense<0.000000e+00> : vector<8x8xf32>
      %255 = tpu.matmul %231, %254, %cst_178 {dimension_numbers = #tpu.dot_dimension_numbers<[1], [0], [0], [1], [0, 0, 1, 1], [], []>} : vector<8x32xbf16>, vector<32x8xbf16>, vector<8x8xf32> -> vector<8x8xf32>
      %256 = arith.truncf %255 : vector<8x8xf32> to vector<8x8xbf16>
      %c3_179 = arith.constant 3 : index
      %c0_180 = arith.constant 0 : index
      %c0_181 = arith.constant 0 : index
      %257 = vector.load %arg15[%c3_179, %c0_180, %c0_181] : memref<4x8x8xbf16, #tpu.memory_space<vmem>>, vector<1x8x8xbf16>
      %258 = vector.shape_cast %257 : vector<1x8x8xbf16> to vector<8x8xbf16>
      %259 = vector.shape_cast %256 : vector<8x8xbf16> to vector<1x8x8xbf16>
      tpu.vector_store %arg15[%c3_179, %c0_180, %c0_181], %259 {strides = array<i32>} : memref<4x8x8xbf16, #tpu.memory_space<vmem>>, vector<1x8x8xbf16>,
      %cst_182 = arith.constant 0xFF800000 : f32
      %260 = vector.broadcast %cst_182 : f32 to vector<4x8x1xf32>
      %c0_183 = arith.constant 0 : index
      %c0_184 = arith.constant 0 : index
      %c0_185 = arith.constant 0 : index
      %261 = vector.load %arg16[%c0_183, %c0_184, %c0_185] : memref<4x8x1xf32, #tpu.memory_space<vmem>>, vector<4x8x1xf32>
      tpu.vector_store %arg16[%c0_183, %c0_184, %c0_185], %260 {strides = array<i32>} : memref<4x8x1xf32, #tpu.memory_space<vmem>>, vector<4x8x1xf32>,
      %cst_186 = arith.constant 0.000000e+00 : f32
      %262 = vector.broadcast %cst_186 : f32 to vector<4x8x1xf32>
      %c0_187 = arith.constant 0 : index
      %c0_188 = arith.constant 0 : index
      %c0_189 = arith.constant 0 : index
      %263 = vector.load %arg17[%c0_187, %c0_188, %c0_189] : memref<4x8x1xf32, #tpu.memory_space<vmem>>, vector<4x8x1xf32>
      tpu.vector_store %arg17[%c0_187, %c0_188, %c0_189], %262 {strides = array<i32>} : memref<4x8x1xf32, #tpu.memory_space<vmem>>, vector<4x8x1xf32>,
      %cst_190 = arith.constant 0.000000e+00 : f32
      %264 = vector.broadcast %cst_190 : f32 to vector<4x8x8xf32>
      %c0_191 = arith.constant 0 : index
      %c0_192 = arith.constant 0 : index
      %c0_193 = arith.constant 0 : index
      %265 = vector.load %arg18[%c0_191, %c0_192, %c0_193] : memref<4x8x8xf32, #tpu.memory_space<vmem>>, vector<4x8x8xf32>
      tpu.vector_store %arg18[%c0_191, %c0_192, %c0_193], %264 {strides = array<i32>} : memref<4x8x8xf32, #tpu.memory_space<vmem>>, vector<4x8x8xf32>,
    } else {
    }
    %c0 = arith.constant 0 : index
    %c0_1 = arith.constant 0 : index
    %c0_2 = arith.constant 0 : index
    %3 = vector.load %arg4[%c0, %c0_1, %c0_2] : memref<1x8x32xf32, #tpu.memory_space<vmem>>, vector<1x8x32xf32>
    %4 = vector.shape_cast %3 : vector<1x8x32xf32> to vector<8x32xf32>
    %c0_3 = arith.constant 0 : index
    %c0_4 = arith.constant 0 : index
    %5 = vector.load %arg7[%c0_3, %c0_4] : memref<1x32xf32, #tpu.memory_space<vmem>>, vector<1x32xf32>
    %c0_5 = arith.constant 0 : index
    %c0_6 = arith.constant 0 : index
    %6 = vector.load %arg8[%c0_5, %c0_6] : memref<1x32xf32, #tpu.memory_space<vmem>>, vector<1x32xf32>
    %cst = arith.constant dense<0.000000e+00> : vector<8xf32>
    %7 = vector.multi_reduction <add>, %4, %cst [1] : vector<8x32xf32> to vector<8xf32>
    %8 = vector.shape_cast %7 : vector<8xf32> to vector<8x1xf32>
    %cst_7 = arith.constant 3.200000e+01 : f32
    %9 = vector.broadcast %cst_7 : f32 to vector<8x1xf32>
    %10 = arith.divf %8, %9 : vector<8x1xf32>
    %11 = vector.broadcast %10 : vector<8x1xf32> to vector<8x32xf32>
    %12 = arith.subf %4, %11 : vector<8x32xf32>
    %13 = arith.mulf %12, %12 : vector<8x32xf32>
    %cst_8 = arith.constant dense<0.000000e+00> : vector<8xf32>
    %14 = vector.multi_reduction <add>, %13, %cst_8 [1] : vector<8x32xf32> to vector<8xf32>
    %15 = vector.shape_cast %14 : vector<8xf32> to vector<8x1xf32>
    %cst_9 = arith.constant 3.200000e+01 : f32
    %16 = vector.broadcast %cst_9 : f32 to vector<8x1xf32>
    %17 = arith.divf %15, %16 : vector<8x1xf32>
    %18 = vector.broadcast %10 : vector<8x1xf32> to vector<8x32xf32>
    %19 = arith.subf %4, %18 : vector<8x32xf32>
    %cst_10 = arith.constant 9.99999974E-6 : f32
    %20 = vector.broadcast %cst_10 : f32 to vector<8x1xf32>
    %21 = arith.addf %17, %20 : vector<8x1xf32>
    %22 = math.rsqrt %21 : vector<8x1xf32>
    %23 = vector.broadcast %22 : vector<8x1xf32> to vector<8x32xf32>
    %24 = arith.mulf %19, %23 : vector<8x32xf32>
    %25 = vector.broadcast %5 : vector<1x32xf32> to vector<8x32xf32>
    %26 = arith.mulf %24, %25 : vector<8x32xf32>
    %27 = vector.broadcast %6 : vector<1x32xf32> to vector<8x32xf32>
    %28 = arith.addf %26, %27 : vector<8x32xf32>
    %29 = arith.truncf %28 : vector<8x32xf32> to vector<8x32xbf16>
    %c0_11 = arith.constant 0 : index
    %c0_12 = arith.constant 0 : index
    %c0_13 = arith.constant 0 : index
    %30 = vector.load %arg10[%c0_11, %c0_12, %c0_13] : memref<4x32x8xbf16, #tpu.memory_space<vmem>>, vector<1x32x8xbf16>
    %31 = vector.shape_cast %30 : vector<1x32x8xbf16> to vector<32x8xbf16>
    %cst_14 = arith.constant dense<0.000000e+00> : vector<8x8xf32>
    %32 = tpu.matmul %29, %31, %cst_14 {dimension_numbers = #tpu.dot_dimension_numbers<[1], [0], [0], [1], [0, 0, 1, 1], [], []>} : vector<8x32xbf16>, vector<32x8xbf16>, vector<8x8xf32> -> vector<8x8xf32>
    %33 = arith.truncf %32 : vector<8x8xf32> to vector<8x8xbf16>
    %c0_15 = arith.constant 0 : index
    %c0_16 = arith.constant 0 : index
    %c0_17 = arith.constant 0 : index
    %34 = vector.load %arg11[%c0_15, %c0_16, %c0_17] : memref<4x32x8xbf16, #tpu.memory_space<vmem>>, vector<1x32x8xbf16>
    %35 = vector.shape_cast %34 : vector<1x32x8xbf16> to vector<32x8xbf16>
    %cst_18 = arith.constant dense<0.000000e+00> : vector<8x8xf32>
    %36 = tpu.matmul %29, %35, %cst_18 {dimension_numbers = #tpu.dot_dimension_numbers<[1], [0], [0], [1], [0, 0, 1, 1], [], []>} : vector<8x32xbf16>, vector<32x8xbf16>, vector<8x8xf32> -> vector<8x8xf32>
    %37 = arith.truncf %36 : vector<8x8xf32> to vector<8x8xbf16>
    %c0_19 = arith.constant 0 : index
    %c0_20 = arith.constant 0 : index
    %c0_21 = arith.constant 0 : index
    %38 = vector.load %arg15[%c0_19, %c0_20, %c0_21] : memref<4x8x8xbf16, #tpu.memory_space<vmem>>, vector<1x8x8xbf16>
    %39 = vector.shape_cast %38 : vector<1x8x8xbf16> to vector<8x8xbf16>
    %cst_22 = arith.constant dense<0.000000e+00> : vector<8x8xf32>
    %40 = tpu.matmul %39, %33, %cst_22 {dimension_numbers = #tpu.dot_dimension_numbers<[1], [1], [0], [0], [0, 0, 1, 0], [], []>} : vector<8x8xbf16>, vector<8x8xbf16>, vector<8x8xf32> -> vector<8x8xf32>
    %c0_23 = arith.constant 0 : index
    %c0_24 = arith.constant 0 : index
    %c0_25 = arith.constant 0 : index
    %41 = vector.load %arg16[%c0_23, %c0_24, %c0_25] : memref<4x8x1xf32, #tpu.memory_space<vmem>>, vector<1x8x1xf32>
    %42 = vector.shape_cast %41 : vector<1x8x1xf32> to vector<8x1xf32>
    %cst_26 = arith.constant dense<0xFF800000> : vector<8xf32>
    %43 = vector.multi_reduction <maximumf>, %40, %cst_26 [1] : vector<8x8xf32> to vector<8xf32>
    %44 = vector.shape_cast %43 : vector<8xf32> to vector<8x1xf32>
    %45 = arith.maximumf %42, %44 : vector<8x1xf32>
    %46 = arith.subf %42, %45 : vector<8x1xf32>
    %47 = math.exp %46 : vector<8x1xf32>
    %48 = vector.broadcast %45 : vector<8x1xf32> to vector<8x8xf32>
    %49 = arith.subf %40, %48 : vector<8x8xf32>
    %50 = math.exp %49 : vector<8x8xf32>
    %c0_27 = arith.constant 0 : index
    %c0_28 = arith.constant 0 : index
    %c0_29 = arith.constant 0 : index
    %51 = vector.load %arg17[%c0_27, %c0_28, %c0_29] : memref<4x8x1xf32, #tpu.memory_space<vmem>>, vector<1x8x1xf32>
    %52 = vector.shape_cast %51 : vector<1x8x1xf32> to vector<8x1xf32>
    %53 = arith.mulf %47, %52 : vector<8x1xf32>
    %cst_30 = arith.constant dense<0.000000e+00> : vector<8xf32>
    %54 = vector.multi_reduction <add>, %50, %cst_30 [1] : vector<8x8xf32> to vector<8xf32>
    %55 = vector.shape_cast %54 : vector<8xf32> to vector<8x1xf32>
    %56 = arith.addf %53, %55 : vector<8x1xf32>
    %c0_31 = arith.constant 0 : index
    %c0_32 = arith.constant 0 : index
    %c0_33 = arith.constant 0 : index
    %57 = vector.load %arg17[%c0_31, %c0_32, %c0_33] : memref<4x8x1xf32, #tpu.memory_space<vmem>>, vector<1x8x1xf32>
    %58 = vector.shape_cast %57 : vector<1x8x1xf32> to vector<8x1xf32>
    %59 = vector.shape_cast %56 : vector<8x1xf32> to vector<1x8x1xf32>
    tpu.vector_store %arg17[%c0_31, %c0_32, %c0_33], %59 {strides = array<i32>} : memref<4x8x1xf32, #tpu.memory_space<vmem>>, vector<1x8x1xf32>,
    %c0_34 = arith.constant 0 : index
    %c0_35 = arith.constant 0 : index
    %c0_36 = arith.constant 0 : index
    %60 = vector.load %arg18[%c0_34, %c0_35, %c0_36] : memref<4x8x8xf32, #tpu.memory_space<vmem>>, vector<1x8x8xf32>
    %61 = vector.shape_cast %60 : vector<1x8x8xf32> to vector<8x8xf32>
    %62 = vector.broadcast %47 : vector<8x1xf32> to vector<8x8xf32>
    %63 = arith.mulf %62, %61 : vector<8x8xf32>
    %64 = arith.truncf %50 : vector<8x8xf32> to vector<8x8xbf16>
    %cst_37 = arith.constant dense<0.000000e+00> : vector<8x8xf32>
    %65 = tpu.matmul %64, %37, %cst_37 {dimension_numbers = #tpu.dot_dimension_numbers<[1], [0], [0], [1], [0, 0, 1, 1], [], []>} : vector<8x8xbf16>, vector<8x8xbf16>, vector<8x8xf32> -> vector<8x8xf32>
    %66 = arith.addf %63, %65 : vector<8x8xf32>
    %c0_38 = arith.constant 0 : index
    %c0_39 = arith.constant 0 : index
    %c0_40 = arith.constant 0 : index
    %67 = vector.load %arg18[%c0_38, %c0_39, %c0_40] : memref<4x8x8xf32, #tpu.memory_space<vmem>>, vector<1x8x8xf32>
    %68 = vector.shape_cast %67 : vector<1x8x8xf32> to vector<8x8xf32>
    %69 = vector.shape_cast %66 : vector<8x8xf32> to vector<1x8x8xf32>
    tpu.vector_store %arg18[%c0_38, %c0_39, %c0_40], %69 {strides = array<i32>} : memref<4x8x8xf32, #tpu.memory_space<vmem>>, vector<1x8x8xf32>,
    %c0_41 = arith.constant 0 : index
    %c0_42 = arith.constant 0 : index
    %c0_43 = arith.constant 0 : index
    %70 = vector.load %arg16[%c0_41, %c0_42, %c0_43] : memref<4x8x1xf32, #tpu.memory_space<vmem>>, vector<1x8x1xf32>
    %71 = vector.shape_cast %70 : vector<1x8x1xf32> to vector<8x1xf32>
    %72 = vector.shape_cast %45 : vector<8x1xf32> to vector<1x8x1xf32>
    tpu.vector_store %arg16[%c0_41, %c0_42, %c0_43], %72 {strides = array<i32>} : memref<4x8x1xf32, #tpu.memory_space<vmem>>, vector<1x8x1xf32>,
    %c1 = arith.constant 1 : index
    %c0_44 = arith.constant 0 : index
    %c0_45 = arith.constant 0 : index
    %73 = vector.load %arg10[%c1, %c0_44, %c0_45] : memref<4x32x8xbf16, #tpu.memory_space<vmem>>, vector<1x32x8xbf16>
    %74 = vector.shape_cast %73 : vector<1x32x8xbf16> to vector<32x8xbf16>
    %cst_46 = arith.constant dense<0.000000e+00> : vector<8x8xf32>
    %75 = tpu.matmul %29, %74, %cst_46 {dimension_numbers = #tpu.dot_dimension_numbers<[1], [0], [0], [1], [0, 0, 1, 1], [], []>} : vector<8x32xbf16>, vector<32x8xbf16>, vector<8x8xf32> -> vector<8x8xf32>
    %76 = arith.truncf %75 : vector<8x8xf32> to vector<8x8xbf16>
    %c1_47 = arith.constant 1 : index
    %c0_48 = arith.constant 0 : index
    %c0_49 = arith.constant 0 : index
    %77 = vector.load %arg11[%c1_47, %c0_48, %c0_49] : memref<4x32x8xbf16, #tpu.memory_space<vmem>>, vector<1x32x8xbf16>
    %78 = vector.shape_cast %77 : vector<1x32x8xbf16> to vector<32x8xbf16>
    %cst_50 = arith.constant dense<0.000000e+00> : vector<8x8xf32>
    %79 = tpu.matmul %29, %78, %cst_50 {dimension_numbers = #tpu.dot_dimension_numbers<[1], [0], [0], [1], [0, 0, 1, 1], [], []>} : vector<8x32xbf16>, vector<32x8xbf16>, vector<8x8xf32> -> vector<8x8xf32>
    %80 = arith.truncf %79 : vector<8x8xf32> to vector<8x8xbf16>
    %c1_51 = arith.constant 1 : index
    %c0_52 = arith.constant 0 : index
    %c0_53 = arith.constant 0 : index
    %81 = vector.load %arg15[%c1_51, %c0_52, %c0_53] : memref<4x8x8xbf16, #tpu.memory_space<vmem>>, vector<1x8x8xbf16>
    %82 = vector.shape_cast %81 : vector<1x8x8xbf16> to vector<8x8xbf16>
    %cst_54 = arith.constant dense<0.000000e+00> : vector<8x8xf32>
    %83 = tpu.matmul %82, %76, %cst_54 {dimension_numbers = #tpu.dot_dimension_numbers<[1], [1], [0], [0], [0, 0, 1, 0], [], []>} : vector<8x8xbf16>, vector<8x8xbf16>, vector<8x8xf32> -> vector<8x8xf32>
    %c1_55 = arith.constant 1 : index
    %c0_56 = arith.constant 0 : index
    %c0_57 = arith.constant 0 : index
    %84 = vector.load %arg16[%c1_55, %c0_56, %c0_57] : memref<4x8x1xf32, #tpu.memory_space<vmem>>, vector<1x8x1xf32>
    %85 = vector.shape_cast %84 : vector<1x8x1xf32> to vector<8x1xf32>
    %cst_58 = arith.constant dense<0xFF800000> : vector<8xf32>
    %86 = vector.multi_reduction <maximumf>, %83, %cst_58 [1] : vector<8x8xf32> to vector<8xf32>
    %87 = vector.shape_cast %86 : vector<8xf32> to vector<8x1xf32>
    %88 = arith.maximumf %85, %87 : vector<8x1xf32>
    %89 = arith.subf %85, %88 : vector<8x1xf32>
    %90 = math.exp %89 : vector<8x1xf32>
    %91 = vector.broadcast %88 : vector<8x1xf32> to vector<8x8xf32>
    %92 = arith.subf %83, %91 : vector<8x8xf32>
    %93 = math.exp %92 : vector<8x8xf32>
    %c1_59 = arith.constant 1 : index
    %c0_60 = arith.constant 0 : index
    %c0_61 = arith.constant 0 : index
    %94 = vector.load %arg17[%c1_59, %c0_60, %c0_61] : memref<4x8x1xf32, #tpu.memory_space<vmem>>, vector<1x8x1xf32>
    %95 = vector.shape_cast %94 : vector<1x8x1xf32> to vector<8x1xf32>
    %96 = arith.mulf %90, %95 : vector<8x1xf32>
    %cst_62 = arith.constant dense<0.000000e+00> : vector<8xf32>
    %97 = vector.multi_reduction <add>, %93, %cst_62 [1] : vector<8x8xf32> to vector<8xf32>
    %98 = vector.shape_cast %97 : vector<8xf32> to vector<8x1xf32>
    %99 = arith.addf %96, %98 : vector<8x1xf32>
    %c1_63 = arith.constant 1 : index
    %c0_64 = arith.constant 0 : index
    %c0_65 = arith.constant 0 : index
    %100 = vector.load %arg17[%c1_63, %c0_64, %c0_65] : memref<4x8x1xf32, #tpu.memory_space<vmem>>, vector<1x8x1xf32>
    %101 = vector.shape_cast %100 : vector<1x8x1xf32> to vector<8x1xf32>
    %102 = vector.shape_cast %99 : vector<8x1xf32> to vector<1x8x1xf32>
    tpu.vector_store %arg17[%c1_63, %c0_64, %c0_65], %102 {strides = array<i32>} : memref<4x8x1xf32, #tpu.memory_space<vmem>>, vector<1x8x1xf32>,
    %c1_66 = arith.constant 1 : index
    %c0_67 = arith.constant 0 : index
    %c0_68 = arith.constant 0 : index
    %103 = vector.load %arg18[%c1_66, %c0_67, %c0_68] : memref<4x8x8xf32, #tpu.memory_space<vmem>>, vector<1x8x8xf32>
    %104 = vector.shape_cast %103 : vector<1x8x8xf32> to vector<8x8xf32>
    %105 = vector.broadcast %90 : vector<8x1xf32> to vector<8x8xf32>
    %106 = arith.mulf %105, %104 : vector<8x8xf32>
    %107 = arith.truncf %93 : vector<8x8xf32> to vector<8x8xbf16>
    %cst_69 = arith.constant dense<0.000000e+00> : vector<8x8xf32>
    %108 = tpu.matmul %107, %80, %cst_69 {dimension_numbers = #tpu.dot_dimension_numbers<[1], [0], [0], [1], [0, 0, 1, 1], [], []>} : vector<8x8xbf16>, vector<8x8xbf16>, vector<8x8xf32> -> vector<8x8xf32>
    %109 = arith.addf %106, %108 : vector<8x8xf32>
    %c1_70 = arith.constant 1 : index
    %c0_71 = arith.constant 0 : index
    %c0_72 = arith.constant 0 : index
    %110 = vector.load %arg18[%c1_70, %c0_71, %c0_72] : memref<4x8x8xf32, #tpu.memory_space<vmem>>, vector<1x8x8xf32>
    %111 = vector.shape_cast %110 : vector<1x8x8xf32> to vector<8x8xf32>
    %112 = vector.shape_cast %109 : vector<8x8xf32> to vector<1x8x8xf32>
    tpu.vector_store %arg18[%c1_70, %c0_71, %c0_72], %112 {strides = array<i32>} : memref<4x8x8xf32, #tpu.memory_space<vmem>>, vector<1x8x8xf32>,
    %c1_73 = arith.constant 1 : index
    %c0_74 = arith.constant 0 : index
    %c0_75 = arith.constant 0 : index
    %113 = vector.load %arg16[%c1_73, %c0_74, %c0_75] : memref<4x8x1xf32, #tpu.memory_space<vmem>>, vector<1x8x1xf32>
    %114 = vector.shape_cast %113 : vector<1x8x1xf32> to vector<8x1xf32>
    %115 = vector.shape_cast %88 : vector<8x1xf32> to vector<1x8x1xf32>
    tpu.vector_store %arg16[%c1_73, %c0_74, %c0_75], %115 {strides = array<i32>} : memref<4x8x1xf32, #tpu.memory_space<vmem>>, vector<1x8x1xf32>,
    %c2 = arith.constant 2 : index
    %c0_76 = arith.constant 0 : index
    %c0_77 = arith.constant 0 : index
    %116 = vector.load %arg10[%c2, %c0_76, %c0_77] : memref<4x32x8xbf16, #tpu.memory_space<vmem>>, vector<1x32x8xbf16>
    %117 = vector.shape_cast %116 : vector<1x32x8xbf16> to vector<32x8xbf16>
    %cst_78 = arith.constant dense<0.000000e+00> : vector<8x8xf32>
    %118 = tpu.matmul %29, %117, %cst_78 {dimension_numbers = #tpu.dot_dimension_numbers<[1], [0], [0], [1], [0, 0, 1, 1], [], []>} : vector<8x32xbf16>, vector<32x8xbf16>, vector<8x8xf32> -> vector<8x8xf32>
    %119 = arith.truncf %118 : vector<8x8xf32> to vector<8x8xbf16>
    %c2_79 = arith.constant 2 : index
    %c0_80 = arith.constant 0 : index
    %c0_81 = arith.constant 0 : index
    %120 = vector.load %arg11[%c2_79, %c0_80, %c0_81] : memref<4x32x8xbf16, #tpu.memory_space<vmem>>, vector<1x32x8xbf16>
    %121 = vector.shape_cast %120 : vector<1x32x8xbf16> to vector<32x8xbf16>
    %cst_82 = arith.constant dense<0.000000e+00> : vector<8x8xf32>
    %122 = tpu.matmul %29, %121, %cst_82 {dimension_numbers = #tpu.dot_dimension_numbers<[1], [0], [0], [1], [0, 0, 1, 1], [], []>} : vector<8x32xbf16>, vector<32x8xbf16>, vector<8x8xf32> -> vector<8x8xf32>
    %123 = arith.truncf %122 : vector<8x8xf32> to vector<8x8xbf16>
    %c2_83 = arith.constant 2 : index
    %c0_84 = arith.constant 0 : index
    %c0_85 = arith.constant 0 : index
    %124 = vector.load %arg15[%c2_83, %c0_84, %c0_85] : memref<4x8x8xbf16, #tpu.memory_space<vmem>>, vector<1x8x8xbf16>
    %125 = vector.shape_cast %124 : vector<1x8x8xbf16> to vector<8x8xbf16>
    %cst_86 = arith.constant dense<0.000000e+00> : vector<8x8xf32>
    %126 = tpu.matmul %125, %119, %cst_86 {dimension_numbers = #tpu.dot_dimension_numbers<[1], [1], [0], [0], [0, 0, 1, 0], [], []>} : vector<8x8xbf16>, vector<8x8xbf16>, vector<8x8xf32> -> vector<8x8xf32>
    %c2_87 = arith.constant 2 : index
    %c0_88 = arith.constant 0 : index
    %c0_89 = arith.constant 0 : index
    %127 = vector.load %arg16[%c2_87, %c0_88, %c0_89] : memref<4x8x1xf32, #tpu.memory_space<vmem>>, vector<1x8x1xf32>
    %128 = vector.shape_cast %127 : vector<1x8x1xf32> to vector<8x1xf32>
    %cst_90 = arith.constant dense<0xFF800000> : vector<8xf32>
    %129 = vector.multi_reduction <maximumf>, %126, %cst_90 [1] : vector<8x8xf32> to vector<8xf32>
    %130 = vector.shape_cast %129 : vector<8xf32> to vector<8x1xf32>
    %131 = arith.maximumf %128, %130 : vector<8x1xf32>
    %132 = arith.subf %128, %131 : vector<8x1xf32>
    %133 = math.exp %132 : vector<8x1xf32>
    %134 = vector.broadcast %131 : vector<8x1xf32> to vector<8x8xf32>
    %135 = arith.subf %126, %134 : vector<8x8xf32>
    %136 = math.exp %135 : vector<8x8xf32>
    %c2_91 = arith.constant 2 : index
    %c0_92 = arith.constant 0 : index
    %c0_93 = arith.constant 0 : index
    %137 = vector.load %arg17[%c2_91, %c0_92, %c0_93] : memref<4x8x1xf32, #tpu.memory_space<vmem>>, vector<1x8x1xf32>
    %138 = vector.shape_cast %137 : vector<1x8x1xf32> to vector<8x1xf32>
    %139 = arith.mulf %133, %138 : vector<8x1xf32>
    %cst_94 = arith.constant dense<0.000000e+00> : vector<8xf32>
    %140 = vector.multi_reduction <add>, %136, %cst_94 [1] : vector<8x8xf32> to vector<8xf32>
    %141 = vector.shape_cast %140 : vector<8xf32> to vector<8x1xf32>
    %142 = arith.addf %139, %141 : vector<8x1xf32>
    %c2_95 = arith.constant 2 : index
    %c0_96 = arith.constant 0 : index
    %c0_97 = arith.constant 0 : index
    %143 = vector.load %arg17[%c2_95, %c0_96, %c0_97] : memref<4x8x1xf32, #tpu.memory_space<vmem>>, vector<1x8x1xf32>
    %144 = vector.shape_cast %143 : vector<1x8x1xf32> to vector<8x1xf32>
    %145 = vector.shape_cast %142 : vector<8x1xf32> to vector<1x8x1xf32>
    tpu.vector_store %arg17[%c2_95, %c0_96, %c0_97], %145 {strides = array<i32>} : memref<4x8x1xf32, #tpu.memory_space<vmem>>, vector<1x8x1xf32>,
    %c2_98 = arith.constant 2 : index
    %c0_99 = arith.constant 0 : index
    %c0_100 = arith.constant 0 : index
    %146 = vector.load %arg18[%c2_98, %c0_99, %c0_100] : memref<4x8x8xf32, #tpu.memory_space<vmem>>, vector<1x8x8xf32>
    %147 = vector.shape_cast %146 : vector<1x8x8xf32> to vector<8x8xf32>
    %148 = vector.broadcast %133 : vector<8x1xf32> to vector<8x8xf32>
    %149 = arith.mulf %148, %147 : vector<8x8xf32>
    %150 = arith.truncf %136 : vector<8x8xf32> to vector<8x8xbf16>
    %cst_101 = arith.constant dense<0.000000e+00> : vector<8x8xf32>
    %151 = tpu.matmul %150, %123, %cst_101 {dimension_numbers = #tpu.dot_dimension_numbers<[1], [0], [0], [1], [0, 0, 1, 1], [], []>} : vector<8x8xbf16>, vector<8x8xbf16>, vector<8x8xf32> -> vector<8x8xf32>
    %152 = arith.addf %149, %151 : vector<8x8xf32>
    %c2_102 = arith.constant 2 : index
    %c0_103 = arith.constant 0 : index
    %c0_104 = arith.constant 0 : index
    %153 = vector.load %arg18[%c2_102, %c0_103, %c0_104] : memref<4x8x8xf32, #tpu.memory_space<vmem>>, vector<1x8x8xf32>
    %154 = vector.shape_cast %153 : vector<1x8x8xf32> to vector<8x8xf32>
    %155 = vector.shape_cast %152 : vector<8x8xf32> to vector<1x8x8xf32>
    tpu.vector_store %arg18[%c2_102, %c0_103, %c0_104], %155 {strides = array<i32>} : memref<4x8x8xf32, #tpu.memory_space<vmem>>, vector<1x8x8xf32>,
    %c2_105 = arith.constant 2 : index
    %c0_106 = arith.constant 0 : index
    %c0_107 = arith.constant 0 : index
    %156 = vector.load %arg16[%c2_105, %c0_106, %c0_107] : memref<4x8x1xf32, #tpu.memory_space<vmem>>, vector<1x8x1xf32>
    %157 = vector.shape_cast %156 : vector<1x8x1xf32> to vector<8x1xf32>
    %158 = vector.shape_cast %131 : vector<8x1xf32> to vector<1x8x1xf32>
    tpu.vector_store %arg16[%c2_105, %c0_106, %c0_107], %158 {strides = array<i32>} : memref<4x8x1xf32, #tpu.memory_space<vmem>>, vector<1x8x1xf32>,
    %c3 = arith.constant 3 : index
    %c0_108 = arith.constant 0 : index
    %c0_109 = arith.constant 0 : index
    %159 = vector.load %arg10[%c3, %c0_108, %c0_109] : memref<4x32x8xbf16, #tpu.memory_space<vmem>>, vector<1x32x8xbf16>
    %160 = vector.shape_cast %159 : vector<1x32x8xbf16> to vector<32x8xbf16>
    %cst_110 = arith.constant dense<0.000000e+00> : vector<8x8xf32>
    %161 = tpu.matmul %29, %160, %cst_110 {dimension_numbers = #tpu.dot_dimension_numbers<[1], [0], [0], [1], [0, 0, 1, 1], [], []>} : vector<8x32xbf16>, vector<32x8xbf16>, vector<8x8xf32> -> vector<8x8xf32>
    %162 = arith.truncf %161 : vector<8x8xf32> to vector<8x8xbf16>
    %c3_111 = arith.constant 3 : index
    %c0_112 = arith.constant 0 : index
    %c0_113 = arith.constant 0 : index
    %163 = vector.load %arg11[%c3_111, %c0_112, %c0_113] : memref<4x32x8xbf16, #tpu.memory_space<vmem>>, vector<1x32x8xbf16>
    %164 = vector.shape_cast %163 : vector<1x32x8xbf16> to vector<32x8xbf16>
    %cst_114 = arith.constant dense<0.000000e+00> : vector<8x8xf32>
    %165 = tpu.matmul %29, %164, %cst_114 {dimension_numbers = #tpu.dot_dimension_numbers<[1], [0], [0], [1], [0, 0, 1, 1], [], []>} : vector<8x32xbf16>, vector<32x8xbf16>, vector<8x8xf32> -> vector<8x8xf32>
    %166 = arith.truncf %165 : vector<8x8xf32> to vector<8x8xbf16>
    %c3_115 = arith.constant 3 : index
    %c0_116 = arith.constant 0 : index
    %c0_117 = arith.constant 0 : index
    %167 = vector.load %arg15[%c3_115, %c0_116, %c0_117] : memref<4x8x8xbf16, #tpu.memory_space<vmem>>, vector<1x8x8xbf16>
    %168 = vector.shape_cast %167 : vector<1x8x8xbf16> to vector<8x8xbf16>
    %cst_118 = arith.constant dense<0.000000e+00> : vector<8x8xf32>
    %169 = tpu.matmul %168, %162, %cst_118 {dimension_numbers = #tpu.dot_dimension_numbers<[1], [1], [0], [0], [0, 0, 1, 0], [], []>} : vector<8x8xbf16>, vector<8x8xbf16>, vector<8x8xf32> -> vector<8x8xf32>
    %c3_119 = arith.constant 3 : index
    %c0_120 = arith.constant 0 : index
    %c0_121 = arith.constant 0 : index
    %170 = vector.load %arg16[%c3_119, %c0_120, %c0_121] : memref<4x8x1xf32, #tpu.memory_space<vmem>>, vector<1x8x1xf32>
    %171 = vector.shape_cast %170 : vector<1x8x1xf32> to vector<8x1xf32>
    %cst_122 = arith.constant dense<0xFF800000> : vector<8xf32>
    %172 = vector.multi_reduction <maximumf>, %169, %cst_122 [1] : vector<8x8xf32> to vector<8xf32>
    %173 = vector.shape_cast %172 : vector<8xf32> to vector<8x1xf32>
    %174 = arith.maximumf %171, %173 : vector<8x1xf32>
    %175 = arith.subf %171, %174 : vector<8x1xf32>
    %176 = math.exp %175 : vector<8x1xf32>
    %177 = vector.broadcast %174 : vector<8x1xf32> to vector<8x8xf32>
    %178 = arith.subf %169, %177 : vector<8x8xf32>
    %179 = math.exp %178 : vector<8x8xf32>
    %c3_123 = arith.constant 3 : index
    %c0_124 = arith.constant 0 : index
    %c0_125 = arith.constant 0 : index
    %180 = vector.load %arg17[%c3_123, %c0_124, %c0_125] : memref<4x8x1xf32, #tpu.memory_space<vmem>>, vector<1x8x1xf32>
    %181 = vector.shape_cast %180 : vector<1x8x1xf32> to vector<8x1xf32>
    %182 = arith.mulf %176, %181 : vector<8x1xf32>
    %cst_126 = arith.constant dense<0.000000e+00> : vector<8xf32>
    %183 = vector.multi_reduction <add>, %179, %cst_126 [1] : vector<8x8xf32> to vector<8xf32>
    %184 = vector.shape_cast %183 : vector<8xf32> to vector<8x1xf32>
    %185 = arith.addf %182, %184 : vector<8x1xf32>
    %c3_127 = arith.constant 3 : index
    %c0_128 = arith.constant 0 : index
    %c0_129 = arith.constant 0 : index
    %186 = vector.load %arg17[%c3_127, %c0_128, %c0_129] : memref<4x8x1xf32, #tpu.memory_space<vmem>>, vector<1x8x1xf32>
    %187 = vector.shape_cast %186 : vector<1x8x1xf32> to vector<8x1xf32>
    %188 = vector.shape_cast %185 : vector<8x1xf32> to vector<1x8x1xf32>
    tpu.vector_store %arg17[%c3_127, %c0_128, %c0_129], %188 {strides = array<i32>} : memref<4x8x1xf32, #tpu.memory_space<vmem>>, vector<1x8x1xf32>,
    %c3_130 = arith.constant 3 : index
    %c0_131 = arith.constant 0 : index
    %c0_132 = arith.constant 0 : index
    %189 = vector.load %arg18[%c3_130, %c0_131, %c0_132] : memref<4x8x8xf32, #tpu.memory_space<vmem>>, vector<1x8x8xf32>
    %190 = vector.shape_cast %189 : vector<1x8x8xf32> to vector<8x8xf32>
    %191 = vector.broadcast %176 : vector<8x1xf32> to vector<8x8xf32>
    %192 = arith.mulf %191, %190 : vector<8x8xf32>
    %193 = arith.truncf %179 : vector<8x8xf32> to vector<8x8xbf16>
    %cst_133 = arith.constant dense<0.000000e+00> : vector<8x8xf32>
    %194 = tpu.matmul %193, %166, %cst_133 {dimension_numbers = #tpu.dot_dimension_numbers<[1], [0], [0], [1], [0, 0, 1, 1], [], []>} : vector<8x8xbf16>, vector<8x8xbf16>, vector<8x8xf32> -> vector<8x8xf32>
    %195 = arith.addf %192, %194 : vector<8x8xf32>
    %c3_134 = arith.constant 3 : index
    %c0_135 = arith.constant 0 : index
    %c0_136 = arith.constant 0 : index
    %196 = vector.load %arg18[%c3_134, %c0_135, %c0_136] : memref<4x8x8xf32, #tpu.memory_space<vmem>>, vector<1x8x8xf32>
    %197 = vector.shape_cast %196 : vector<1x8x8xf32> to vector<8x8xf32>
    %198 = vector.shape_cast %195 : vector<8x8xf32> to vector<1x8x8xf32>
    tpu.vector_store %arg18[%c3_134, %c0_135, %c0_136], %198 {strides = array<i32>} : memref<4x8x8xf32, #tpu.memory_space<vmem>>, vector<1x8x8xf32>,
    %c3_137 = arith.constant 3 : index
    %c0_138 = arith.constant 0 : index
    %c0_139 = arith.constant 0 : index
    %199 = vector.load %arg16[%c3_137, %c0_138, %c0_139] : memref<4x8x1xf32, #tpu.memory_space<vmem>>, vector<1x8x1xf32>
    %200 = vector.shape_cast %199 : vector<1x8x1xf32> to vector<8x1xf32>
    %201 = vector.shape_cast %174 : vector<8x1xf32> to vector<1x8x1xf32>
    tpu.vector_store %arg16[%c3_137, %c0_138, %c0_139], %201 {strides = array<i32>} : memref<4x8x1xf32, #tpu.memory_space<vmem>>, vector<1x8x1xf32>,
    %c0_i32_140 = arith.constant 0 : i32
    %202 = arith.cmpi eq, %arg2, %c0_i32_140 : i32
    %203 = arith.extui %202 : i1 to i32
    %c0_i32_141 = arith.constant 0 : i32
    %204 = arith.cmpi ne, %203, %c0_i32_141 : i32
    scf.if %204 {
      %c0_142 = arith.constant 0 : index
      %c0_143 = arith.constant 0 : index
      %c0_144 = arith.constant 0 : index
      %205 = vector.load %arg3[%c0_142, %c0_143, %c0_144] : memref<1x8x32xf32, #tpu.memory_space<vmem>>, vector<1x8x32xf32>
      %206 = vector.shape_cast %205 : vector<1x8x32xf32> to vector<8x32xf32>
      %c0_145 = arith.constant 0 : index
      %c0_146 = arith.constant 0 : index
      %207 = vector.load %arg13[%c0_145, %c0_146] : memref<1x32xf32, #tpu.memory_space<vmem>>, vector<1x32xf32>
      %208 = vector.broadcast %207 : vector<1x32xf32> to vector<8x32xf32>
      %209 = arith.addf %206, %208 : vector<8x32xf32>
      %c0_147 = arith.constant 0 : index
      %c0_148 = arith.constant 0 : index
      %c0_149 = arith.constant 0 : index
      %210 = vector.load %arg18[%c0_147, %c0_148, %c0_149] : memref<4x8x8xf32, #tpu.memory_space<vmem>>, vector<1x8x8xf32>
      %211 = vector.shape_cast %210 : vector<1x8x8xf32> to vector<8x8xf32>
      %c0_150 = arith.constant 0 : index
      %c0_151 = arith.constant 0 : index
      %c0_152 = arith.constant 0 : index
      %212 = vector.load %arg17[%c0_150, %c0_151, %c0_152] : memref<4x8x1xf32, #tpu.memory_space<vmem>>, vector<1x8x1xf32>
      %213 = vector.shape_cast %212 : vector<1x8x1xf32> to vector<8x1xf32>
      %214 = tpu.reciprocal %213 {approx = true} : vector<8x1xf32> -> vector<8x1xf32>
      %215 = vector.broadcast %214 : vector<8x1xf32> to vector<8x8xf32>
      %216 = arith.mulf %211, %215 : vector<8x8xf32>
      %217 = arith.truncf %216 : vector<8x8xf32> to vector<8x8xbf16>
      %c0_153 = arith.constant 0 : index
      %c0_154 = arith.constant 0 : index
      %c0_155 = arith.constant 0 : index
      %218 = vector.load %arg12[%c0_153, %c0_154, %c0_155] : memref<4x8x32xbf16, #tpu.memory_space<vmem>>, vector<1x8x32xbf16>
      %219 = vector.shape_cast %218 : vector<1x8x32xbf16> to vector<8x32xbf16>
      %cst_156 = arith.constant dense<0.000000e+00> : vector<8x32xf32>
      %220 = tpu.matmul %217, %219, %cst_156 {dimension_numbers = #tpu.dot_dimension_numbers<[1], [0], [0], [1], [0, 0, 1, 1], [], []>} : vector<8x8xbf16>, vector<8x32xbf16>, vector<8x32xf32> -> vector<8x32xf32>
      %221 = arith.addf %209, %220 : vector<8x32xf32>
      %c1_157 = arith.constant 1 : index
      %c0_158 = arith.constant 0 : index
      %c0_159 = arith.constant 0 : index
      %222 = vector.load %arg18[%c1_157, %c0_158, %c0_159] : memref<4x8x8xf32, #tpu.memory_space<vmem>>, vector<1x8x8xf32>
      %223 = vector.shape_cast %222 : vector<1x8x8xf32> to vector<8x8xf32>
      %c1_160 = arith.constant 1 : index
      %c0_161 = arith.constant 0 : index
      %c0_162 = arith.constant 0 : index
      %224 = vector.load %arg17[%c1_160, %c0_161, %c0_162] : memref<4x8x1xf32, #tpu.memory_space<vmem>>, vector<1x8x1xf32>
      %225 = vector.shape_cast %224 : vector<1x8x1xf32> to vector<8x1xf32>
      %226 = tpu.reciprocal %225 {approx = true} : vector<8x1xf32> -> vector<8x1xf32>
      %227 = vector.broadcast %226 : vector<8x1xf32> to vector<8x8xf32>
      %228 = arith.mulf %223, %227 : vector<8x8xf32>
      %229 = arith.truncf %228 : vector<8x8xf32> to vector<8x8xbf16>
      %c1_163 = arith.constant 1 : index
      %c0_164 = arith.constant 0 : index
      %c0_165 = arith.constant 0 : index
      %230 = vector.load %arg12[%c1_163, %c0_164, %c0_165] : memref<4x8x32xbf16, #tpu.memory_space<vmem>>, vector<1x8x32xbf16>
      %231 = vector.shape_cast %230 : vector<1x8x32xbf16> to vector<8x32xbf16>
      %cst_166 = arith.constant dense<0.000000e+00> : vector<8x32xf32>
      %232 = tpu.matmul %229, %231, %cst_166 {dimension_numbers = #tpu.dot_dimension_numbers<[1], [0], [0], [1], [0, 0, 1, 1], [], []>} : vector<8x8xbf16>, vector<8x32xbf16>, vector<8x32xf32> -> vector<8x32xf32>
      %233 = arith.addf %221, %232 : vector<8x32xf32>
      %c2_167 = arith.constant 2 : index
      %c0_168 = arith.constant 0 : index
      %c0_169 = arith.constant 0 : index
      %234 = vector.load %arg18[%c2_167, %c0_168, %c0_169] : memref<4x8x8xf32, #tpu.memory_space<vmem>>, vector<1x8x8xf32>
      %235 = vector.shape_cast %234 : vector<1x8x8xf32> to vector<8x8xf32>
      %c2_170 = arith.constant 2 : index
      %c0_171 = arith.constant 0 : index
      %c0_172 = arith.constant 0 : index
      %236 = vector.load %arg17[%c2_170, %c0_171, %c0_172] : memref<4x8x1xf32, #tpu.memory_space<vmem>>, vector<1x8x1xf32>
      %237 = vector.shape_cast %236 : vector<1x8x1xf32> to vector<8x1xf32>
      %238 = tpu.reciprocal %237 {approx = true} : vector<8x1xf32> -> vector<8x1xf32>
      %239 = vector.broadcast %238 : vector<8x1xf32> to vector<8x8xf32>
      %240 = arith.mulf %235, %239 : vector<8x8xf32>
      %241 = arith.truncf %240 : vector<8x8xf32> to vector<8x8xbf16>
      %c2_173 = arith.constant 2 : index
      %c0_174 = arith.constant 0 : index
      %c0_175 = arith.constant 0 : index
      %242 = vector.load %arg12[%c2_173, %c0_174, %c0_175] : memref<4x8x32xbf16, #tpu.memory_space<vmem>>, vector<1x8x32xbf16>
      %243 = vector.shape_cast %242 : vector<1x8x32xbf16> to vector<8x32xbf16>
      %cst_176 = arith.constant dense<0.000000e+00> : vector<8x32xf32>
      %244 = tpu.matmul %241, %243, %cst_176 {dimension_numbers = #tpu.dot_dimension_numbers<[1], [0], [0], [1], [0, 0, 1, 1], [], []>} : vector<8x8xbf16>, vector<8x32xbf16>, vector<8x32xf32> -> vector<8x32xf32>
      %245 = arith.addf %233, %244 : vector<8x32xf32>
      %c3_177 = arith.constant 3 : index
      %c0_178 = arith.constant 0 : index
      %c0_179 = arith.constant 0 : index
      %246 = vector.load %arg18[%c3_177, %c0_178, %c0_179] : memref<4x8x8xf32, #tpu.memory_space<vmem>>, vector<1x8x8xf32>
      %247 = vector.shape_cast %246 : vector<1x8x8xf32> to vector<8x8xf32>
      %c3_180 = arith.constant 3 : index
      %c0_181 = arith.constant 0 : index
      %c0_182 = arith.constant 0 : index
      %248 = vector.load %arg17[%c3_180, %c0_181, %c0_182] : memref<4x8x1xf32, #tpu.memory_space<vmem>>, vector<1x8x1xf32>
      %249 = vector.shape_cast %248 : vector<1x8x1xf32> to vector<8x1xf32>
      %250 = tpu.reciprocal %249 {approx = true} : vector<8x1xf32> -> vector<8x1xf32>
      %251 = vector.broadcast %250 : vector<8x1xf32> to vector<8x8xf32>
      %252 = arith.mulf %247, %251 : vector<8x8xf32>
      %253 = arith.truncf %252 : vector<8x8xf32> to vector<8x8xbf16>
      %c3_183 = arith.constant 3 : index
      %c0_184 = arith.constant 0 : index
      %c0_185 = arith.constant 0 : index
      %254 = vector.load %arg12[%c3_183, %c0_184, %c0_185] : memref<4x8x32xbf16, #tpu.memory_space<vmem>>, vector<1x8x32xbf16>
      %255 = vector.shape_cast %254 : vector<1x8x32xbf16> to vector<8x32xbf16>
      %cst_186 = arith.constant dense<0.000000e+00> : vector<8x32xf32>
      %256 = tpu.matmul %253, %255, %cst_186 {dimension_numbers = #tpu.dot_dimension_numbers<[1], [0], [0], [1], [0, 0, 1, 1], [], []>} : vector<8x8xbf16>, vector<8x32xbf16>, vector<8x32xf32> -> vector<8x32xf32>
      %257 = arith.addf %245, %256 : vector<8x32xf32>
      %c0_187 = arith.constant 0 : index
      %c0_188 = arith.constant 0 : index
      %c0_189 = arith.constant 0 : index
      %258 = vector.load %arg14[%c0_187, %c0_188, %c0_189] : memref<1x8x32xf32, #tpu.memory_space<vmem>>, vector<1x8x32xf32>
      %259 = vector.shape_cast %258 : vector<1x8x32xf32> to vector<8x32xf32>
      %260 = vector.shape_cast %257 : vector<8x32xf32> to vector<1x8x32xf32>
      tpu.vector_store %arg14[%c0_187, %c0_188, %c0_189], %260 {strides = array<i32>} : memref<1x8x32xf32, #tpu.memory_space<vmem>>, vector<1x8x32xf32>,
    } else {
    }
    return
  }
  func.func @transform_0(%arg0: i32, %arg1: i32, %arg2: i32) -> (i32, i32, i32) {
    %c0_i32 = arith.constant 0 : i32
    %c0_i32_0 = arith.constant 0 : i32
    return %arg0, %arg1, %c0_i32 : i32, i32, i32
  }
  func.func @transform_1(%arg0: i32, %arg1: i32, %arg2: i32) -> (i32, i32, i32) {
    %c0_i32 = arith.constant 0 : i32
    %c0_i32_0 = arith.constant 0 : i32
    return %arg0, %arg2, %c0_i32 : i32, i32, i32
  }
  func.func @transform_2(%arg0: i32, %arg1: i32, %arg2: i32) -> (i32, i32) {
    %c0_i32 = arith.constant 0 : i32
    %c0_i32_0 = arith.constant 0 : i32
    %c0_i32_1 = arith.constant 0 : i32
    return %c0_i32, %c0_i32_0 : i32, i32
  }
  func.func @transform_3(%arg0: i32, %arg1: i32, %arg2: i32) -> (i32, i32) {
    %c0_i32 = arith.constant 0 : i32
    %c0_i32_0 = arith.constant 0 : i32
    %c0_i32_1 = arith.constant 0 : i32
    return %c0_i32, %c0_i32_0 : i32, i32
  }
  func.func @transform_4(%arg0: i32, %arg1: i32, %arg2: i32) -> (i32, i32) {
    %c0_i32 = arith.constant 0 : i32
    %c0_i32_0 = arith.constant 0 : i32
    %c0_i32_1 = arith.constant 0 : i32
    return %c0_i32, %c0_i32_0 : i32, i32
  }
  func.func @transform_5(%arg0: i32, %arg1: i32, %arg2: i32) -> (i32, i32) {
    %c0_i32 = arith.constant 0 : i32
    %c0_i32_0 = arith.constant 0 : i32
    %c0_i32_1 = arith.constant 0 : i32
    return %c0_i32, %c0_i32_0 : i32, i32
  }
  func.func @transform_6(%arg0: i32, %arg1: i32, %arg2: i32) -> (i32, i32, i32) {
    %c0_i32 = arith.constant 0 : i32
    %c0_i32_0 = arith.constant 0 : i32
    %c0_i32_1 = arith.constant 0 : i32
    %c0_i32_2 = arith.constant 0 : i32
    return %c0_i32, %c0_i32_0, %c0_i32_1 : i32, i32, i32
  }
  func.func @transform_7(%arg0: i32, %arg1: i32, %arg2: i32) -> (i32, i32, i32) {
    %c0_i32 = arith.constant 0 : i32
    %c0_i32_0 = arith.constant 0 : i32
    %c0_i32_1 = arith.constant 0 : i32
    %c0_i32_2 = arith.constant 0 : i32
    return %c0_i32, %c0_i32_0, %c0_i32_1 : i32, i32, i32
  }
  func.func @transform_8(%arg0: i32, %arg1: i32, %arg2: i32) -> (i32, i32, i32) {
    %c0_i32 = arith.constant 0 : i32
    %c0_i32_0 = arith.constant 0 : i32
    %c0_i32_1 = arith.constant 0 : i32
    %c0_i32_2 = arith.constant 0 : i32
    return %c0_i32, %c0_i32_0, %c0_i32_1 : i32, i32, i32
  }
  func.func @transform_9(%arg0: i32, %arg1: i32, %arg2: i32) -> (i32, i32, i32) {
    %c0_i32 = arith.constant 0 : i32
    %c0_i32_0 = arith.constant 0 : i32
    %c0_i32_1 = arith.constant 0 : i32
    %c0_i32_2 = arith.constant 0 : i32
    return %c0_i32, %c0_i32_0, %c0_i32_1 : i32, i32, i32
  }
  func.func @transform_10(%arg0: i32, %arg1: i32, %arg2: i32) -> (i32, i32) {
    %c0_i32 = arith.constant 0 : i32
    %c0_i32_0 = arith.constant 0 : i32
    %c0_i32_1 = arith.constant 0 : i32
    return %c0_i32, %c0_i32_0 : i32, i32
  }
  func.func @transform_11(%arg0: i32, %arg1: i32, %arg2: i32) -> (i32, i32, i32) {
    %c0_i32 = arith.constant 0 : i32
    %c0_i32_0 = arith.constant 0 : i32
    return %arg0, %arg1, %c0_i32 : i32, i32, i32
  }
}

</mosaic_0001>

<bundles_post_ra>
// kernel: tpu_custom_call.1
= control target key start
LH: loop header
LB: loop body
LE: loop exit
PB: predicated region body
PF: predicated region fallthrough
CT: control target
= control target key end

     0   :  { %s2224_s0 = inlined_call_operand.vmem [shape: f32[2,8,32], index: 0, kind: input, shape index: {}]   ;;  %s2225_s1 = inlined_call_operand.vmem [shape: f32[2,8,32], index: 1, kind: input, shape index: {}]   ;;  %s2226_s2 = inlined_call_operand.vmem [shape: f32[1,32], index: 2, kind: input, shape index: {}]   ;;  %s2227_s3 = inlined_call_operand.vmem [shape: f32[1,32], index: 3, kind: input, shape index: {}]   ;;  %s2228_s4 = inlined_call_operand.vmem [shape: f32[1,32], index: 4, kind: input, shape index: {}]   ;;  %s2229_s5 = inlined_call_operand.vmem [shape: f32[1,32], index: 5, kind: input, shape index: {}]   ;;  %s2230_s6 = inlined_call_operand.vmem [shape: bf16[4,32,8], index: 6, kind: input, shape index: {}]   ;;  %s2231_s7 = inlined_call_operand.vmem [shape: bf16[4,32,8], index: 7, kind: input, shape index: {}]   ;;  %s2232_s8 = inlined_call_operand.vmem [shape: bf16[4,32,8], index: 8, kind: input, shape index: {}]   ;;  %s2233_s9 = inlined_call_operand.vmem [shape: bf16[4,8,32], index: 9, kind: input, shape index: {}]   ;;  %s2234_s10 = inlined_call_operand.vmem [shape: f32[1,32], index: 10, kind: input, shape index: {}]   ;;  %s2235_s11 = inlined_call_operand.hbm [shape: f32[2,8,32], index: 11, kind: output, shape index: {}]  }
   0x1   :  { %2236 = sst [smem:[#allocation9_spill]] %s2224_s0 }
   0x2   :  { %2237 = sst [smem:[#allocation10_spill]] %s2225_s1 }
   0x3   :  { %16 = vsyncpa [#allocation7], 0 }
   0x4   :  { %18 = vsyncpa [#allocation7 + $0x1], 0  ;;  %s1914_s17 = smov 0   ;;  %s1916_s18 = smov 0  }
   0x5   :  { %s1918_s19 = smov 0   ;;  %s1920_s20 = smov 0  }
   0x6   :  { %s1922_s21 = smov 0   ;;  %s1924_s22 = smov 0  }
   0x7 LB: > { %s1478_s23 = sadd.s32 4294967295, %s1848_s22   ;;  %s1479_s24 = sadd.s32 4294967294, %s1848_s22   ;;  %s1848_s22 = sphi %s1924_s22, %s24_s22   ;;  %s1844_s21 = sphi %s1922_s21, %s2246_s21   ;;  %s1840_s20 = sphi %s1920_s20, %s2245_s20   ;;  %s1836_s19 = sphi %s1918_s19, %s2244_s19   ;;  %s1832_s18 = sphi %s1916_s18, %s2243_s18   ;;  %s1828_s17 = sphi %s1914_s17, %s2242_s17  }
   0x8   : > { %s43_s25 = sadd.s32 1, %s1844_s21  ;;  %s297_s26 = sadd.s32 1, %s1836_s19 }
   0x9   : > { %p45_p0 = scmp.ge.s32.totalorder %s43_s25, 2  ;;  %p307_p1 = scmp.ne.s32.totalorder %s1836_s19, %s1832_s18 }
   0xa   : > { %p308_p2 = scmp.eq.s32.totalorder %s1478_s23, 1  ;;  %p313_p3 = scmp.ne.s32.totalorder %s1832_s18, %s1828_s17 }
   0xb   : > { %s2248_s25 = smov (%p45_p0, %s43_s25), 0  ;;  %p314_p5 = scmp.eq.s32.totalorder %s1479_s24, 1 }
   0xc   : > { %p1954_p4 = por %p308_p2, %p307_p1  ;;  %s292_s28 = ssub.s32 %s1844_s21, %s2248_s25 }
   0xd   : > { %p1482_p6 = scmp.ge.s32.totalorder %s1848_s22, 1  ;;  %p295_p7 = scmp.eq.s32.totalorder %s292_s28, 0 }
   0xe   : > { %p1961_p8 = por %p314_p5, %p313_p3  ;;  %p379_p9 = scmp.lt.s32.totalorder %s1848_s22, 3 }
   0xf   : > { %s1967_s30 = scalar_select %p295_p7, %s1836_s19, %s297_s26  }
  0x10   : > { %p380_p10 = pnand %p1482_p6, %p379_p9 }
  0x11   : > { %p428_p11 = scmp.lt.s32.totalorder (!%p380_p10), %s1840_s20, 1  ;;  %s2240_s0 = sld [smem:[#allocation9_spill]] (!%p380_p10) }
  0x12   : > { %383 = sbr.rel (%p380_p10) target bundleno = 1268 (0x4f4), region = 64  ;;  %s2241_s1 = sld [smem:[#allocation10_spill]] (!%p380_p10) }
  0x13   : > { %s1646_s23 = sshll.u32 (!%p380_p10), %s1840_s20, 3 }
  0x17   : > { %s429_s12 = scalar_select %p428_p11, %s1840_s20, 1  ;;  %vm450_vm0 = vcmask 261120   ;;  %v1850_v4 = vmov 32.0   ;;  %v1650_v21 = vld [vmem:[%s2230_s6 + $0x8] sm:$0xff]  ;;  %v1652_v22 = vld [vmem:[%s2230_s6 + $0x18] sm:$0xff]  ;;  %v1649_v25 = vld [vmem:[%s2230_s6] sm:$0xff] }
  0x18   : > { %1740 = vrcp.f32 %v1850_v4  ;;  %v1654_v23 = vld [vmem:[%s2230_s6 + $0x28] sm:$0xff]  ;;  %v1656_v24 = vld [vmem:[%s2230_s6 + $0x38] sm:$0xff]  ;;  %514 = vmatpush.bf16.msra.mxu0 %v1650_v21  ;;  %547 = vmatpush.bf16.msra.mxu1 %v1652_v22  ;;  %v1651_v26 = vld [vmem:[%s2230_s6 + $0x10] sm:$0xff]  ;;  %vm522_vm8 = vcmask 60416   ;;  %vm632_vm9 = vcmask 64512   ;;  %vm798_vm10 = vcmask 1043456  }
  0x19   : > { %s1484_s13 = sshll.u32 %s429_s12, 3  ;;  %580 = vmatpush.bf16.msra.mxu2 %v1654_v23  ;;  %613 = vmatpush.bf16.msra.mxu3 %v1656_v24  ;;  %v1653_v27 = vld [vmem:[%s2230_s6 + $0x20] sm:$0xff]  ;;  %v1655_v28 = vld [vmem:[%s2230_s6 + $0x30] sm:$0xff]  ;;  %v1658_v32 = vld [vmem:[%s2231_s7 + $0x8] sm:$0xff]  ;;  %vm623_vm11 = vcmask 7168   ;;  %s1384_s12 = scalar_lea.hbm %s2235_s11, %s1646_s23 }
  0x1a   : > { %s434_s16 = scalar_lea.vmem %s2240_s0, %s1484_s13  ;;  %s441_s26 = scalar_lea.vmem %s2241_s1, %s1484_s13  ;;  %v1660_v33 = vld [vmem:[%s2232_s8 + $0x8] sm:$0xff]  ;;  %v1657_v34 = vld [vmem:[%s2231_s7] sm:$0xff]  ;;  %v1662_v58 = vld [vmem:[%s2231_s7 + $0x18] sm:$0xff] }
  0x1b   : > { %v1974_v0 = vld [vmem:[%s434_s16] sm:$0xff]  ;;  %v1664_v59 = vld [vmem:[%s2232_s8 + $0x18] sm:$0xff]  ;;  %v1661_v63 = vld [vmem:[%s2231_s7 + $0x10] sm:$0xff]  ;;  %s425_s0 = sand.u32 1, %s1832_s18   ;;  %s1388_s1 = sshll.u32 %s1384_s12, 4  ;;  %s1389_s1 = int_to_ptr.hbm [resolvable:$true] %s1388_s1 }
  0x1c   : > { %v451_v1 = vsel %vm450_vm0, %v1974_v0, 0.0  ;;  %v637_v2 = vld [vmem:[%s441_s26] sm:$0xff]  ;;  %515 = vmatpush.bf16.msra.mxu0 %v1649_v25  ;;  %548 = vmatpush.bf16.msra.mxu1 %v1651_v26  ;;  %s1483_s24 = sshll.u32 %s425_s0, 3  ;;  %s1373_s15 = scalar_lea.sflag [#allocation7], %s425_s0 }
  0x1d   : > { %452 = vadd.xlane.f32.xlu0 %v451_v1  ;;  %v641_v3 = vsel %vm450_vm0, %v637_v2, 0.0  ;;  %581 = vmatpush.bf16.msra.mxu2 %v1653_v27  ;;  %v1659_v35 = vld [vmem:[%s2232_s8] sm:$0xff]  ;;  %v1663_v1 = vld [vmem:[%s2232_s8 + $0x10] sm:$0xff]  ;;  %s427_s13 = scalar_lea.vmem [#allocation6], %s1483_s24  ;;  %s1784_s16 = sshra.s32 %s1389_s1, 4  ;;  %s1785_s16 = int_to_ptr.hbm [resolvable:$true] %s1784_s16 }
  0x1e   : > { %v1741_v5 = vpop.eup %1740  ;;  %614 = vmatpush.bf16.msra.mxu3 %v1655_v28  ;;  %v1737_v47 = vld [vmem:[%s2226_s2] ss:$0 sm:$0xff]  ;;  %s1386_s14 = sshll.u32 %s427_s13, 4  ;;  %s1786_s20 = scalar_lea.hbm %s1785_s16, 8  ;;  %s1387_s14 = int_to_ptr.vmem [resolvable:$true] %s1386_s14 }
  0x1f   : > { %v455_v6 = vmul.f32 32.0, %v1741_v5  ;;  %vm459_vm1 = vweird.f32 %v1741_v5  ;;  %v1738_v51 = vld [vmem:[%s2227_s3] ss:$0 sm:$0xff]  ;;  %p1787_p12 = scmp.ne.s32.totalorder %s1785_s16, %s1786_s20  ;;  %s1790_s24 = scalar_lea.hbm %s2235_s11, 16 }
  0x20   : > { %704 = vmatpush.bf16.msrb.mxu0 %v1658_v32  ;;  %734 = vmatpush.bf16.msrb.mxu1 %v1660_v33  ;;  %v1735_v61 = vld [vmem:[%s2228_s4] ss:$0 sm:$0xff]  ;;  %p1791_p1 = scmp.lt.s32.totalorder %s1785_s16, %s2235_s11  ;;  %p1792_p2 = scmp.lt.s32.totalorder %s1790_s24, %s1786_s20 }
  0x21   : > { %v456_v7 = vsub.f32 1.0, %v455_v6  ;;  %v1668_v6 = vld [vmem:[%s2232_s8 + $0x28] sm:$0xff]  ;;  %p1788_p13 = pnand %p1787_p12, %p1954_p4 }
  0x22   : > { %p1793_p3 = por %p1792_p2, %p1791_p1 }
  0x23   : > { %v457_v8 = vmul.f32 %v1741_v5, %v456_v7  ;;  %p1789_p0 = pneg %p1788_p13 }
  0x24   : > { %705 = vmatpush.bf16.msrb.mxu0 %v1657_v34  ;;  %735 = vmatpush.bf16.msrb.mxu1 %v1659_v35 }
  0x25   : > { %642 = vadd.xlane.f32.xlu0 %v641_v3  ;;  %v458_v9 = vadd.f32 %v1741_v5, %v457_v8  ;;  %v1665_v8 = vld [vmem:[%s2231_s7 + $0x20] sm:$0xff]  ;;  %p1794_p5 = pnand %p1793_p3, %p1789_p0 }
  0x27   : > { %v460_v10 = vsel %vm459_vm1, %v1741_v5, %v458_v9  ;;  %v1666_v5 = vld [vmem:[%s2231_s7 + $0x28] sm:$0xff]  ;;  %v1667_v9 = vld [vmem:[%s2232_s8 + $0x20] sm:$0xff] }
  0x90   : > { %v453_v11 = vpop.xlane.xlu0 %452 }
  0x91   : > { %v461_v12 = vmul.f32 %v460_v10, %v453_v11  ;;  %v1672_v11 = vld [vmem:[%s2232_s8 + $0x38] sm:$0xff] }
  0x93   : > { %v462_v13 = vsub.f32 %v1974_v0, %v461_v12  ;;  %v1669_v12 = vld [vmem:[%s2231_s7 + $0x30] sm:$0xff] }
  0x95   : > { %v463_v14 = vmul.f32 %v462_v13, %v462_v13 }
  0x97   : > { %v464_v15 = vsel %vm450_vm0, %v463_v14, 0.0 }
  0x98   : > { %465 = vadd.xlane.f32.xlu1 %v464_v15  ;;  %v643_v16 = vpop.xlane.xlu0 %642 }
  0x99   : > { %v651_v17 = vmul.f32 %v643_v16, %v460_v10 }
  0x9b   : > { %v1984_v18 = vsub.f32 %v637_v2, %v651_v17  ;;  %v1736_v2 = vld [vmem:[%s2229_s5] ss:$0 sm:$0xff] }
  0x9d   : > { %v653_v19 = vmul.f32 %v1984_v18, %v1984_v18 }
  0x9f   : > { %v654_v20 = vsel %vm450_vm0, %v653_v19, 0.0 }
  0xa0   : > { %655 = vadd.xlane.f32.xlu1 %v654_v20 }
 0x10b   : > { %v466_v29 = vpop.xlane.xlu1 %465 }
 0x10c   : > { %v467_v30 = vmul.f32 %v466_v29, %v460_v10 }
 0x10e   : > { %v468_v31 = vadd.f32 1e-05, %v467_v30 }
 0x110   : > { %1742 = vrsqrt.f32 %v468_v31  ;;  %vm475_vm3 = vweird.f32 %v468_v31 }
 0x113   : > { %v656_v36 = vpop.xlane.xlu1 %655 }
 0x114   : > { %v657_v37 = vmul.f32 %v656_v36, %v460_v10  ;;  %v1670_v10 = vld [vmem:[%s2231_s7 + $0x38] sm:$0xff] }
 0x116   : > { %v1743_v38 = vpop.eup %1742  ;;  %v658_v39 = vadd.f32 1e-05, %v657_v37 }
 0x117   : > { %v470_v40 = vmul.f32 %v1743_v38, %v468_v31  ;;  %vm476_vm2 = vweird.f32 %v1743_v38 }
 0x118   : > { %1744 = vrsqrt.f32 %v658_v39  ;;  %vm477_vm4 = vmor %vm475_vm3, %vm476_vm2  ;;  %vm665_vm5 = vweird.f32 %v658_v39 }
 0x119   : > { %v471_v41 = vmul.f32 %v1743_v38, %v470_v40 }
 0x11b   : > { %v472_v42 = vmul.f32 0.5, %v471_v41 }
 0x11d   : > { %v473_v43 = vsub.f32 1.5, %v472_v42 }
 0x11e   : > { %v1745_v44 = vpop.eup %1744 }
 0x11f   : > { %v474_v45 = vmul.f32 %v1743_v38, %v473_v43  ;;  %v660_v46 = vmul.f32 %v1745_v44, %v658_v39  ;;  %vm666_vm6 = vweird.f32 %v1745_v44 }
 0x120   : > { %vm667_vm7 = vmor %vm665_vm5, %vm666_vm6 }
 0x121   : > { %v478_v48 = vsel %vm477_vm4, %v1743_v38, %v474_v45  ;;  %v661_v49 = vmul.f32 %v1745_v44, %v660_v46 }
 0x122   : > { %v479_v50 = vmul.f32 %v478_v48, %v462_v13  ;;  %v1671_v13 = vld [vmem:[%s2232_s8 + $0x30] sm:$0xff] }
 0x123   : > { %v662_v52 = vmul.f32 0.5, %v661_v49 }
 0x124   : > { %v483_v53 = vmul.f32 %v1737_v47, %v479_v50 }
 0x125   : > { %v663_v54 = vsub.f32 1.5, %v662_v52 }
 0x126   : > { %v487_v55 = vadd.f32 %v1738_v51, %v483_v53 }
 0x127   : > { %v664_v56 = vmul.f32 %v1745_v44, %v663_v54 }
 0x128   : > { %v488_v57 = vpack.c.bf16 %v487_v55, %v487_v55 }
 0x129   : > { %v668_v60 = vsel %vm667_vm7, %v1745_v44, %v664_v56 }
 0x12a   : > { %1494 = vmatmul.msk.bf16.vlgmr.msra.gmra.mxu0 %vm450_vm0, %v488_v57  ;;  %1507 = vmatmul.msk.bf16.vlgmr.msra.gmra.mxu1 %vm450_vm0, %v488_v57  ;;  %v669_v62 = vmul.f32 %v668_v60, %v1984_v18 }
 0x12b   : > { %1520 = vmatmul.msk.bf16.vlgmr.msra.gmra.mxu2 %vm450_vm0, %v488_v57  ;;  %1533 = vmatmul.msk.bf16.vlgmr.msra.gmra.mxu3 %vm450_vm0, %v488_v57 }
 0x12c   : > { %841 = vmatpush.bf16.msra.mxu0 %v1662_v58  ;;  %872 = vmatpush.bf16.msra.mxu1 %v1664_v59  ;;  %v673_v3 = vmul.f32 %v1735_v61, %v669_v62 }
 0x12e   : > { %v677_v4 = vadd.f32 %v1736_v2, %v673_v3 }
 0x130   : > { %842 = vmatpush.bf16.msra.mxu0 %v1661_v63  ;;  %873 = vmatpush.bf16.msra.mxu1 %v1663_v1  ;;  %v678_v7 = vpack.c.bf16 %v677_v4, %v677_v4  ;;  %v1851_v1 = vmov -inf  }
 0x131   : > { %624 = vst.msk [vmem:[#allocation3] sm:$0xff] %vm623_vm11, %v1851_v1 }
 0x132   : > { %625 = vst.msk [vmem:[#allocation3 + $0x8] sm:$0xff] %vm623_vm11, %v1851_v1 }
 0x133   : > { %626 = vst.msk [vmem:[#allocation3 + $0x10] sm:$0xff] %vm623_vm11, %v1851_v1 }
 0x134   : > { %627 = vst.msk [vmem:[#allocation3 + $0x18] sm:$0xff] %vm623_vm11, %v1851_v1 }
 0x13a   : > { %1542 = vmatmul.msk.bf16.vlgmr.msrb.gmra.mxu0 %vm450_vm0, %v678_v7  ;;  %1551 = vmatmul.msk.bf16.vlgmr.msrb.gmra.mxu1 %vm450_vm0, %v678_v7 }
 0x13b   : > { %980 = vmatpush.bf16.msrb.mxu0 %v1666_v5  ;;  %1011 = vmatpush.bf16.msrb.mxu1 %v1668_v6 }
 0x13f   : > { %981 = vmatpush.bf16.msrb.mxu0 %v1665_v8  ;;  %1012 = vmatpush.bf16.msrb.mxu1 %v1667_v9  ;;  %v1852_v8 = vmov 0   ;;  %v1853_v9 = vmov 0.0  }
 0x140   : > { %1732 = vset.pattern.permute.xlu1 %v1852_v8  ;;  %1733 = vset.pattern.permute.xlu0 %v1852_v8  ;;  %628 = vst.msk [vmem:[#allocation4] sm:$0xff] %vm623_vm11, %v1853_v9 }
 0x141   : > { %1734 = vset.pattern.permute.xlu2 %v1852_v8  ;;  %629 = vst.msk [vmem:[#allocation4 + $0x8] sm:$0xff] %vm623_vm11, %v1853_v9 }
 0x142   : > { %630 = vst.msk [vmem:[#allocation4 + $0x10] sm:$0xff] %vm623_vm11, %v1853_v9 }
 0x143   : > { %631 = vst.msk [vmem:[#allocation4 + $0x18] sm:$0xff] %vm623_vm11, %v1853_v9 }
 0x144   : > { %633 = vst.msk [vmem:[#allocation5] sm:$0xff] %vm632_vm9, %v1853_v9 }
 0x145   : > { %634 = vst.msk [vmem:[#allocation5 + $0x8] sm:$0xff] %vm632_vm9, %v1853_v9 }
 0x146   : > { %635 = vst.msk [vmem:[#allocation5 + $0x10] sm:$0xff] %vm632_vm9, %v1853_v9 }
 0x147   : > { %636 = vst.msk [vmem:[#allocation5 + $0x18] sm:$0xff] %vm632_vm9, %v1853_v9 }
 0x148   : > { %v919_v8 = vld [vmem:[#allocation4 + $0x8] sm:$0xff] }
 0x14a   : > { %1566 = vmatmul.msk.bf16.vlgmr.msra.gmra.mxu0 %vm450_vm0, %v678_v7  ;;  %1579 = vmatmul.msk.bf16.vlgmr.msra.gmra.mxu1 %vm450_vm0, %v678_v7 }
 0x14b   : > { %1119 = vmatpush.bf16.msra.mxu0 %v1670_v10  ;;  %1150 = vmatpush.bf16.msra.mxu1 %v1672_v11  ;;  %v763_v10 = vld [vmem:[#allocation3] sm:$0xff] }
 0x14f   : > { %1120 = vmatpush.bf16.msra.mxu0 %v1669_v12  ;;  %1151 = vmatpush.bf16.msra.mxu1 %v1671_v13 }
 0x15a   : > { %1594 = vmatmul.msk.bf16.vlgmr.msrb.gmra.mxu0 %vm450_vm0, %v678_v7  ;;  %1607 = vmatmul.msk.bf16.vlgmr.msrb.gmra.mxu1 %vm450_vm0, %v678_v7 }
 0x16a   : > { %1622 = vmatmul.msk.bf16.vlgmr.msra.gmra.mxu0 %vm450_vm0, %v678_v7  ;;  %1635 = vmatmul.msk.bf16.vlgmr.msra.gmra.mxu1 %vm450_vm0, %v678_v7 }
 0x1a7   : > { %v517_v14 = vpop.f32.mrf.mxu0  ;;  %v550_v15 = vpop.f32.mrf.mxu1 }
 0x1a8   : > { %v521_v16 = vpack.c.bf16 %v517_v14, %v517_v14  ;;  %v554_v17 = vpack.c.bf16 %v550_v15, %v550_v15  ;;  %v2123_v14 = vld [vmem:[#allocation3 + $0x8] sm:$0xff] }
 0x1aa   : > { %523 = vst.msk [vmem:[#allocation2] sm:$0xf] %vm522_vm8, %v521_v16 }
 0x1ab   : > { %556 = vst.msk [vmem:[#allocation2 + $0x4] sm:$0xf] %vm522_vm8, %v554_v17 }
 0x1ae   : > { %v583_v18 = vpop.f32.mrf.mxu2  ;;  %v616_v19 = vpop.f32.mrf.mxu3 }
 0x1af   : > { %v587_v20 = vpack.c.bf16 %v583_v18, %v583_v18  ;;  %v620_v21 = vpack.c.bf16 %v616_v19, %v616_v19  ;;  %v519_v22 = vpop.f32.mrf.mxu0  ;;  %v552_v23 = vpop.f32.mrf.mxu1  ;;  %v1041_v18 = vld [vmem:[#allocation3 + $0x10] sm:$0xff] }
 0x1b0   : > { %v1180_v22 = vld [vmem:[#allocation3 + $0x18] sm:$0xff] }
 0x1b1   : > { %589 = vst.msk [vmem:[#allocation2 + $0x8] sm:$0xf] %vm522_vm8, %v587_v20  ;;  %v742_v34 = vld [vmem:[#allocation2] sm:$0xf] }
 0x1b2   : > { %622 = vst.msk [vmem:[#allocation2 + $0xc] sm:$0xf] %vm522_vm8, %v620_v21  ;;  %v881_v43 = vld [vmem:[#allocation2 + $0x4] sm:$0xf] }
 0x1b6   : > { %v585_v24 = vpop.f32.mrf.mxu2  ;;  %v618_v25 = vpop.f32.mrf.mxu3 }
 0x1b7   : > { %v707_v26 = vpop.f32.mrf.mxu0  ;;  %v737_v27 = vpop.f32.mrf.mxu1 }
 0x1b8   : > { %v711_v28 = vpack.c.bf16 %v707_v26, %v707_v26  ;;  %v741_v29 = vpack.c.bf16 %v737_v27, %v737_v27  ;;  %v1020_v50 = vld [vmem:[#allocation2 + $0x8] sm:$0xf] }
 0x1b9   : > { %v1159_v57 = vld [vmem:[#allocation2 + $0xc] sm:$0xf] }
 0x1ba   : > { %v748_v30 = vsel %vm632_vm9, %v711_v28, 0  ;;  %v800_v31 = vsel %vm798_vm10, %v741_v29, 0 }
 0x1bb   : > { %757 = vmatpush.bf16.xpose.msrb.mxu2 %v748_v30  ;;  %809 = vmatpush.bf16.msrb.mxu3 %v800_v31 }
 0x1bf   : > { %v709_v32 = vpop.f32.mrf.mxu0  ;;  %v739_v33 = vpop.f32.mrf.mxu1 }
 0x1c2   : > { %1552 = vmatmul.msk.bf16.vlgmr.msrb.gmra.mxu2 %vm632_vm9, %v742_v34 }
 0x1c7   : > { %v844_v35 = vpop.f32.mrf.mxu0  ;;  %v875_v36 = vpop.f32.mrf.mxu1 }
 0x1c8   : > { %v848_v37 = vpack.c.bf16 %v844_v35, %v844_v35  ;;  %v879_v38 = vpack.c.bf16 %v875_v36, %v875_v36 }
 0x1ca   : > { %v886_v39 = vsel %vm632_vm9, %v848_v37, 0  ;;  %v939_v40 = vsel %vm798_vm10, %v879_v38, 0 }
 0x1cb   : > { %895 = vmatpush.bf16.xpose.msra.mxu2 %v886_v39  ;;  %948 = vmatpush.bf16.msra.mxu3 %v939_v40 }
 0x1cf   : > { %v846_v41 = vpop.f32.mrf.mxu0  ;;  %v877_v42 = vpop.f32.mrf.mxu1 }
 0x1d2   : > { %1580 = vmatmul.msk.bf16.vlgmr.msra.gmra.mxu2 %vm632_vm9, %v881_v43 }
 0x1d7   : > { %v983_v44 = vpop.f32.mrf.mxu0  ;;  %v2092_v45 = vpop.f32.mrf.mxu1 }
 0x1d8   : > { %v987_v46 = vpack.c.bf16 %v983_v44, %v983_v44  ;;  %v1018_v31 = vpack.c.bf16 %v2092_v45, %v2092_v45 }
 0x1da   : > { %v1025_v47 = vsel %vm632_vm9, %v987_v46, 0  ;;  %v1078_v36 = vsel %vm798_vm10, %v1018_v31, 0 }
 0x1db   : > { %1034 = vmatpush.bf16.xpose.msrb.mxu2 %v1025_v47 }
 0x1df   : > { %v985_v48 = vpop.f32.mrf.mxu0  ;;  %v1016_v49 = vpop.f32.mrf.mxu1 }
 0x1e2   : > { %1608 = vmatmul.msk.bf16.vlgmr.msrb.gmra.mxu2 %vm632_vm9, %v1020_v50 }
 0x1e7   : > { %v1122_v51 = vpop.f32.mrf.mxu0  ;;  %v2096_v52 = vpop.f32.mrf.mxu1 }
 0x1e8   : > { %v1126_v53 = vpack.c.bf16 %v1122_v51, %v1122_v51  ;;  %v1157_v43 = vpack.c.bf16 %v2096_v52, %v2096_v52 }
 0x1ea   : > { %v1164_v54 = vsel %vm632_vm9, %v1126_v53, 0  ;;  %v1217_v47 = vsel %vm798_vm10, %v1157_v43, 0  ;;  %v927_v43 = vld [vmem:[#allocation5 + $0x8] sm:$0xff] }
 0x1eb   : > { %1173 = vmatpush.bf16.xpose.msra.mxu2 %v1164_v54 }
 0x1ef   : > { %v1124_v55 = vpop.f32.mrf.mxu0  ;;  %v1155_v56 = vpop.f32.mrf.mxu1 }
 0x1f2   : > { %1636 = vmatmul.msk.bf16.vlgmr.msra.gmra.mxu2 %vm632_vm9, %v1159_v57 }
 0x245   : > { %v759_v58 = vpop.f32.mrf.mxu2 }
 0x246   : > { %v764_v59 = vsel %vm632_vm9, %v759_v58, -inf }
 0x247   : > { %765 = vmax.xlane.f32.xlu2 %v764_v59 }
 0x24d   : > { %v761_v60 = vpop.f32.mrf.mxu2 }
 0x255   : > { %v2101_v61 = vpop.f32.mrf.mxu2 }
 0x256   : > { %v903_v62 = vsel %vm632_vm9, %v2101_v61, -inf }
 0x257   : > { %904 = vmax.xlane.f32.xlu2 %v903_v62  ;;  %v779_v62 = vld [vmem:[#allocation4] sm:$0xff] }
 0x25d   : > { %v899_v63 = vpop.f32.mrf.mxu2 }
 0x265   : > { %v1036_v2 = vpop.f32.mrf.mxu2 }
 0x266   : > { %v1042_v3 = vsel %vm632_vm9, %v1036_v2, -inf }
 0x267   : > { %1043 = vmax.xlane.f32.xlu0 %v1042_v3  ;;  %v1058_v3 = vld [vmem:[#allocation4 + $0x10] sm:$0xff] }
 0x26d   : > { %v1038_v4 = vpop.f32.mrf.mxu2 }
 0x275   : > { %v2110_v5 = vpop.f32.mrf.mxu2 }
 0x276   : > { %v1181_v6 = vsel %vm632_vm9, %v2110_v5, -inf }
 0x277   : > { %1182 = vmax.xlane.f32.xlu2 %v1181_v6 }
 0x27d   : > { %v1177_v7 = vpop.f32.mrf.mxu2 }
 0x2ba   : > { %v766_v11 = vpop.xlane.xlu2 %765 }
 0x2bb   : > { %v767_v12 = vmax.f32 %v763_v10, %v766_v11 }
 0x2bd   : > { %v768_v13 = vsub.f32 %v763_v10, %v767_v12  ;;  %817 = vst.msk [vmem:[#allocation3] sm:$0xff] %vm623_vm11, %v767_v12  ;;  %773 = vperm.xlu1 %1732, %v767_v12  }
 0x2bf   : > { %v769_v42 = vmul.f32 1.442695, %v768_v13 }
 0x2ca   : > { %v905_v15 = vpop.xlane.xlu2 %904 }
 0x2cb   : > { %v2126_v16 = vmax.f32 %v2123_v14, %v905_v15 }
 0x2cd   : > { %v907_v17 = vsub.f32 %v2123_v14, %v2126_v16  ;;  %956 = vst.msk [vmem:[#allocation3 + $0x8] sm:$0xff] %vm623_vm11, %v2126_v16  ;;  %912 = vperm.xlu0 %1733, %v2126_v16   ;;  %v787_v14 = vld [vmem:[#allocation5] sm:$0xff] }
 0x2cf   : > { %v908_v59 = vmul.f32 1.442695, %v907_v17 }
 0x2da   : > { %v1044_v19 = vpop.xlane.xlu0 %1043 }
 0x2db   : > { %v1045_v20 = vmax.f32 %v1041_v18, %v1044_v19 }
 0x2dd   : > { %v1046_v21 = vsub.f32 %v1041_v18, %v1045_v20  ;;  %1095 = vst.msk [vmem:[#allocation3 + $0x10] sm:$0xff] %vm623_vm11, %v1045_v20  ;;  %1051 = vperm.xlu2 %1734, %v1045_v20  }
 0x2ea   : > { %v1183_v23 = vpop.xlane.xlu2 %1182 }
 0x2eb   : > { %v1184_v24 = vmax.f32 %v1180_v22, %v1183_v23 }
 0x2ed   : > { %v1185_v25 = vsub.f32 %v1180_v22, %v1184_v24  ;;  %1234 = vst.msk [vmem:[#allocation3 + $0x18] sm:$0xff] %vm623_vm11, %v1184_v24  ;;  %1190 = vperm.xlu1 %1732, %v1184_v24  }
 0x2ef   : > { %v1186_v49 = vmul.f32 1.442695, %v1185_v25  ;;  %v1197_v25 = vld [vmem:[#allocation4 + $0x18] sm:$0xff] }
 0x32f   : > { %v774_v26 = vpop.permute.xlu1 %773 }
 0x330   : > { %v776_v27 = vsub.f32 %v759_v58, %v774_v26  ;;  %v1047_v58 = vmul.f32 1.442695, %v1046_v21 }
 0x332   : > { %v777_v28 = vmul.f32 1.442695, %v776_v27 }
 0x334   : > { %1746 = vpow2.f32 %v777_v28 }
 0x337   : > { %v1052_v29 = vpop.permute.xlu2 %1051 }
 0x338   : > { %v1054_v30 = vsub.f32 %v1036_v2, %v1052_v29 }
 0x33a   : > { %v1747_v32 = vpop.eup %1746  ;;  %v1055_v33 = vmul.f32 1.442695, %v1054_v30 }
 0x33b   : > { %v781_v34 = vsel %vm632_vm9, %v1747_v32, 0.0  ;;  %v794_v35 = vpack.c.bf16 %v1747_v32, %v1747_v32  ;;  %v1205_v32 = vld [vmem:[#allocation5 + $0x18] sm:$0xff] }
 0x33c   : > { %1748 = vpow2.f32 %v1055_v33  ;;  %782 = vadd.xlane.f32.xlu0 %v781_v34 }
 0x33d   : > { %1553 = vmatmul.msk.bf16.vlgmr.msrb.gmra.mxu3 %vm632_vm9, %v794_v35 }
 0x33e   : > { %1087 = vmatpush.bf16.msrb.mxu3 %v1078_v36 }
 0x33f   : > { %v913_v37 = vpop.permute.xlu0 %912 }
 0x340   : > { %v915_v38 = vsub.f32 %v2101_v61, %v913_v37 }
 0x342   : > { %v1749_v39 = vpop.eup %1748  ;;  %v916_v40 = vmul.f32 1.442695, %v915_v38  ;;  %v1066_v38 = vld [vmem:[#allocation5 + $0x10] sm:$0xff] }
 0x343   : > { %v1060_v41 = vsel %vm632_vm9, %v1749_v39, 0.0  ;;  %v1073_v50 = vpack.c.bf16 %v1749_v39, %v1749_v39 }
 0x344   : > { %1750 = vpow2.f32 %v916_v40  ;;  %1061 = vadd.xlane.f32.xlu2 %v1060_v41 }
 0x345   : > { %1752 = vpow2.f32 %v769_v42 }
 0x346   : > { %1754 = vpow2.f32 %v1186_v49  ;;  %v1639_v49 = vld [vmem:[%s2233_s9 + $0x4] sm:$0xf] }
 0x34a   : > { %v1751_v44 = vpop.eup %1750 }
 0x34b   : > { %v934_v45 = vpack.c.bf16 %v1751_v44, %v1751_v44  ;;  %v921_v46 = vsel %vm632_vm9, %v1751_v44, 0.0  ;;  %v1753_v48 = vpop.eup %1752 }
 0x34c   : > { %922 = vadd.xlane.f32.xlu2 %v921_v46  ;;  %v1755_v54 = vpop.eup %1754  ;;  %v780_v63 = vmul.f32 %v1753_v48, %v779_v62 }
 0x34d   : > { %1581 = vmatmul.msk.bf16.vlgmr.msra.gmra.mxu3 %vm632_vm9, %v934_v45  ;;  %v1198_v26 = vmul.f32 %v1755_v54, %v1197_v25 }
 0x34e   : > { %1226 = vmatpush.bf16.msra.mxu3 %v1217_v47  ;;  %v1641_v47 = vld [vmem:[%s2233_s9 + $0x8] sm:$0xf] }
 0x350   : > { %790 = vperm.xlu0 %1733, %v1753_v48   ;;  %v1323_v48 = vsel %vm798_vm10, %v1641_v47, 0 }
 0x351   : > { %1332 = vmatpush.bf16.msrb.mxu2 %v1323_v48 }
 0x35d   : > { %1609 = vmatmul.msk.bf16.vlgmr.msrb.gmra.mxu3 %vm632_vm9, %v1073_v50  ;;  %v1291_v50 = vsel %vm798_vm10, %v1639_v49, 0 }
 0x35e   : > { %1300 = vmatpush.bf16.msrb.mxu1 %v1291_v50 }
 0x35f   : > { %v1191_v51 = vpop.permute.xlu1 %1190 }
 0x360   : > { %v1193_v52 = vsub.f32 %v2110_v5, %v1191_v51  ;;  %v1254_v51 = vld [vmem:[%s2233_s9] sm:$0xf] }
 0x362   : > { %v1194_v53 = vmul.f32 1.442695, %v1193_v52  ;;  %v1259_v52 = vsel %vm798_vm10, %v1254_v51, 0 }
 0x363   : > { %1268 = vmatpush.bf16.msrb.mxu0 %v1259_v52 }
 0x364   : > { %1756 = vpow2.f32 %v1194_v53  ;;  %1208 = vperm.xlu2 %1734, %v1755_v54   ;;  %v1643_v53 = vld [vmem:[%s2233_s9 + $0xc] sm:$0xf] }
 0x365   : > { %1758 = vpow2.f32 %v1047_v58  ;;  %v1355_v54 = vsel %vm798_vm10, %v1643_v53, 0 }
 0x366   : > { %1760 = vpow2.f32 %v908_v59  ;;  %1364 = vmatpush.bf16.msrb.mxu3 %v1355_v54 }
 0x36a   : > { %v1757_v55 = vpop.eup %1756 }
 0x36b   : > { %v1212_v56 = vpack.c.bf16 %v1757_v55, %v1757_v55  ;;  %v1199_v57 = vsel %vm632_vm9, %v1757_v55, 0.0  ;;  %v1759_v60 = vpop.eup %1758 }
 0x36c   : > { %1200 = vadd.xlane.f32.xlu1 %v1199_v57  ;;  %v1761_v61 = vpop.eup %1760  ;;  %v1059_v4 = vmul.f32 %v1759_v60, %v1058_v3 }
 0x36d   : > { %1637 = vmatmul.msk.bf16.vlgmr.msra.gmra.mxu3 %vm632_vm9, %v1212_v56  ;;  %v920_v9 = vmul.f32 %v1761_v61, %v919_v8 }
 0x385   : > { %1069 = vperm.xlu1 %1732, %v1759_v60  }
 0x38d   : > { %930 = vperm.xlu1 %1732, %v1761_v61  }
 0x3af   : > { %v783_v1 = vpop.xlane.xlu0 %782 }
 0x3b0   : > { %v784_v2 = vadd.f32 %v783_v1, %v780_v63 }
 0x3b2   : > { %786 = vst.msk [vmem:[#allocation4] sm:$0xff] %vm623_vm11, %v784_v2 }
 0x3b7   : > { %v1062_v5 = vpop.xlane.xlu2 %1061 }
 0x3b8   : > { %v1063_v6 = vadd.f32 %v1062_v5, %v1059_v4 }
 0x3b9   : > { %v1245_v7 = vld [vmem:[#allocation4] sm:$0xff] }
 0x3ba   : > { %1064 = vst.msk [vmem:[#allocation4 + $0x10] sm:$0xff] %vm623_vm11, %v1063_v6  ;;  %1762 = vrcp.f32 %v1245_v7 }
 0x3bf   : > { %v923_v10 = vpop.xlane.xlu2 %922 }
 0x3c0   : > { %v1763_v11 = vpop.eup %1762  ;;  %v924_v12 = vadd.f32 %v923_v10, %v920_v9  ;;  %v811_v13 = vpop.f32.mrf.mxu3 }
 0x3c1   : > { %1249 = vperm.xlu0 %1733, %v1763_v11   ;;  %v1308_v15 = vld [vmem:[#allocation4 + $0x10] sm:$0xff] }
 0x3c2   : > { %925 = vst.msk [vmem:[#allocation4 + $0x8] sm:$0xff] %vm623_vm11, %v924_v12  ;;  %v791_v16 = vpop.permute.xlu0 %790  ;;  %1764 = vrcp.f32 %v1308_v15 }
 0x3c3   : > { %v793_v17 = vmul.f32 %v791_v16, %v787_v14  ;;  %v1739_v14 = vld [vmem:[%s2234_s10] ss:$0 sm:$0xff] }
 0x3c4   : > { %v1243_v15 = vadd.f32 %v1739_v14, %v1974_v0 }
 0x3c5   : > { %v815_v18 = vadd.f32 %v811_v13, %v793_v17 }
 0x3c7   : > { %816 = vst.msk [vmem:[#allocation5] sm:$0xff] %vm632_vm9, %v815_v18  ;;  %v1209_v33 = vpop.permute.xlu2 %1208 }
 0x3c8   : > { %v1765_v19 = vpop.eup %1764  ;;  %v813_v20 = vpop.f32.mrf.mxu3  ;;  %v1211_v34 = vmul.f32 %v1209_v33, %v1205_v32 }
 0x3c9   : > { %1312 = vperm.xlu2 %1734, %v1765_v19   ;;  %v1276_v21 = vld [vmem:[#allocation4 + $0x8] sm:$0xff] }
 0x3ca   : > { %1766 = vrcp.f32 %v1276_v21 }
 0x3ce   : > { %v1244_v63 = vld [vmem:[#allocation5] sm:$0xff] }
 0x3d0   : > { %v1767_v22 = vpop.eup %1766  ;;  %v950_v23 = vpop.f32.mrf.mxu3 }
 0x3d1   : > { %1280 = vperm.xlu2 %1734, %v1767_v22  }
 0x3d8   : > { %v952_v24 = vpop.f32.mrf.mxu3 }
 0x3df   : > { %v1201_v27 = vpop.xlane.xlu1 %1200 }
 0x3e0   : > { %v1202_v28 = vadd.f32 %v1201_v27, %v1198_v26  ;;  %v1089_v29 = vpop.f32.mrf.mxu3 }
 0x3e2   : > { %1203 = vst.msk [vmem:[#allocation4 + $0x18] sm:$0xff] %vm623_vm11, %v1202_v28 }
 0x3e8   : > { %v1091_v30 = vpop.f32.mrf.mxu3 }
 0x3e9   : > { %v1340_v31 = vld [vmem:[#allocation4 + $0x18] sm:$0xff] }
 0x3ea   : > { %1768 = vrcp.f32 %v1340_v31 }
 0x3f0   : > { %v1769_v35 = vpop.eup %1768  ;;  %v1228_v36 = vpop.f32.mrf.mxu3 }
 0x3f1   : > { %v1232_v37 = vadd.f32 %v1228_v36, %v1211_v34  ;;  %1344 = vperm.xlu1 %1732, %v1769_v35  }
 0x3f3   : > { %1233 = vst.msk [vmem:[#allocation5 + $0x18] sm:$0xff] %vm632_vm9, %v1232_v37 }
 0x3f7   : > { %v1070_v39 = vpop.permute.xlu1 %1069 }
 0x3f8   : > { %v1072_v40 = vmul.f32 %v1070_v39, %v1066_v38  ;;  %v1230_v41 = vpop.f32.mrf.mxu3 }
 0x3fa   : > { %v1093_v42 = vadd.f32 %v1089_v29, %v1072_v40  ;;  %v1339_v5 = vld [vmem:[#allocation5 + $0x18] sm:$0xff] }
 0x3fc   : > { %1094 = vst.msk [vmem:[#allocation5 + $0x10] sm:$0xff] %vm632_vm9, %v1093_v42 }
 0x3ff   : > { %v931_v44 = vpop.permute.xlu1 %930 }
 0x400   : > { %v933_v45 = vmul.f32 %v931_v44, %v927_v43 }
 0x402   : > { %v954_v46 = vadd.f32 %v950_v23, %v933_v45 }
 0x403   : > { %v1307_v55 = vld [vmem:[#allocation5 + $0x10] sm:$0xff] }
 0x404   : > { %955 = vst.msk [vmem:[#allocation5 + $0x8] sm:$0xff] %vm632_vm9, %v954_v46 }
 0x40b   : > { %v1275_v59 = vld [vmem:[#allocation5 + $0x8] sm:$0xff] }
 0x423   : > { %v1313_v56 = vpop.permute.xlu2 %1312 }
 0x424   : > { %v1315_v57 = vmul.f32 %v1313_v56, %v1307_v55 }
 0x426   : > { %v1316_v58 = vpack.c.bf16 %v1315_v57, %v1315_v57 }
 0x428   : > { %1642 = vmatmul.msk.bf16.vlgmr.msrb.gmra.mxu2 %vm632_vm9, %v1316_v58 }
 0x42b   : > { %v1281_v60 = vpop.permute.xlu2 %1280 }
 0x42c   : > { %v1283_v61 = vmul.f32 %v1281_v60, %v1275_v59 }
 0x42e   : > { %v1284_v62 = vpack.c.bf16 %v1283_v61, %v1283_v61 }
 0x430   : > { %1640 = vmatmul.msk.bf16.vlgmr.msrb.gmra.mxu1 %vm632_vm9, %v1284_v62 }
 0x433   : > { %v1250_v1 = vpop.permute.xlu0 %1249 }
 0x434   : > { %v1252_v2 = vmul.f32 %v1250_v1, %v1244_v63 }
 0x436   : > { %v1253_v3 = vpack.c.bf16 %v1252_v2, %v1252_v2 }
 0x438   : > { %1638 = vmatmul.msk.bf16.vlgmr.msrb.gmra.mxu0 %vm632_vm9, %v1253_v3 }
 0x463   : > { %v1345_v4 = vpop.permute.xlu1 %1344 }
 0x464   : > { %v1347_v6 = vmul.f32 %v1345_v4, %v1339_v5 }
 0x466   : > { %v1348_v7 = vpack.c.bf16 %v1347_v6, %v1347_v6 }
 0x468   : > { %1644 = vmatmul.msk.bf16.vlgmr.msrb.gmra.mxu3 %vm632_vm9, %v1348_v7 }
 0x4ab   : > { %v1334_v8 = vpop.f32.mrf.mxu2 }
 0x4ad   : > { %v1302_v9 = vpop.f32.mrf.mxu1 }
 0x4b3   : > { %v1336_v10 = vpop.f32.mrf.mxu2 }
 0x4b5   : > { %v1270_v11 = vpop.f32.mrf.mxu0  ;;  %v1304_v12 = vpop.f32.mrf.mxu1 }
 0x4b6   : > { %v1274_v16 = vadd.f32 %v1270_v11, %v1243_v15 }
 0x4b8   : > { %v1306_v17 = vadd.f32 %v1302_v9, %v1274_v16 }
 0x4ba   : > { %v1338_v18 = vadd.f32 %v1334_v8, %v1306_v17 }
 0x4bd   : > { %v1272_v13 = vpop.f32.mrf.mxu0 }
 0x4eb   : > { %v1366_v19 = vpop.f32.mrf.mxu3 }
 0x4ec   : > { %v1370_v20 = vadd.f32 %v1366_v19, %v1338_v18 }
 0x4ee   : > { %1371 = vst.msk [vmem:[%s427_s13] sm:$0xff] %vm450_vm0, %v1370_v20 }
 0x4ef   : > { %1797 = shalt.err (!%p1794_p5)
}
 0x4f0   : > { %1673 = dma.vmem_to_hbm [thread:$0]  (%p1954_p4), %s1387_s14, 128, %s1389_s1, %s1373_s15  }
 0x4f3   : > { %v1368_v0 = vpop.f32.mrf.mxu3 }
 0x4f4 PF: > { %p1679_p6 = scmp.ge.s32.totalorder %s1848_s22, 2  ;;  %s1400_s0 = sand.u32 1, %s1828_s17  }
 0x4f5   : > { %s1401_s13 = scalar_lea.sflag [#allocation7], %s1400_s0 }
 0x4f6   : > { %p1676_p7 = pnand %p1679_p6, %p1961_p8 }
 0x4f8   : > { %p1677_p9 = pneg %p1676_p7 }
 0x4fa   : > { %1823 = dma.done.wait (%p1677_p9), %s1401_s13, 128  }
 0x4fb   : > { %1825 = vsyncadd (%p1677_p9), %s1401_s13, 4294967168  ;;  %s24_s22 = sadd.s32 1, %s1848_s22   ;;  %s2242_s17 = smov %s1832_s18 }
 0x4fc   : > { %p21_p10 = scmp.ge.s32.totalorder %s24_s22, 4   ;;  %s2243_s18 = smov %s1836_s19 }
 0x4fd   : > { %s2244_s19 = smov %s1967_s30  ;;  %s2245_s20 = smov %s1844_s21 }
 0x4fe   : > { %s2246_s21 = smov %s2248_s25  ;;  %23 = sbr.rel (!%p21_p10) target bundleno = 7 (0x7), region = 137 }
 0x503   :  { %1407 = vsyncpa [#allocation7], 1 }
 0x504   :  { %1409 = vsyncpa [#allocation7 + $0x1], 1 }

</bundles_post_ra>
